<compile_context>
chip_gen: v5e
topology: v5e:2x2
jax: 0.10.0
libtpu: 0.0.40
codegen_flags: <defaults>
</compile_context>

<pallas_src>
import jax
import jax.numpy as jnp
from jax.experimental import pallas as pl
from jax.experimental.pallas import tpu as pltpu

# ---- synthetic tiny-BERT config (small shapes, deterministic init) ----
VOCAB = 64
MAX_POS = 16
TYPE_VOCAB = 2
HIDDEN = 32
NUM_HEADS = 4
HEAD_DIM = HIDDEN // NUM_HEADS
INTER = 64
NUM_LAYERS = 2
LN_EPS = 1e-12


# ----------------------------- kernel helpers -----------------------------
def _ln(x, g, b):
    mu = jnp.mean(x, axis=-1, keepdims=True)
    var = jnp.mean(jnp.square(x - mu), axis=-1, keepdims=True)
    return (x - mu) * jax.lax.rsqrt(var + LN_EPS) * g + b


def _gelu(x):
    # TODO(synk): HF BERT default is exact erf-GELU; tanh approximation used here.
    return 0.5 * x * (1.0 + jnp.tanh(0.7978845608028654 * (x + 0.044715 * x * x * x)))


# ------------------------------- fused kernel ------------------------------
def bert_encoder_kernel(emb_ref, maskb_ref, eg_ref, eb_ref,
                        wq_ref, bq_ref, wk_ref, bk_ref, wv_ref, bv_ref,
                        wo_ref, bo_ref, g1_ref, be1_ref,
                        wi_ref, bi_ref, wf_ref, bf_ref, g2_ref, be2_ref,
                        pw_ref, pb_ref,
                        hid_ref, pooled_ref, x_sc):
    """One grid step == one transformer layer. x_sc is the resident (B*S, H) carry."""
    layer = pl.program_id(0)
    B, S, H = hid_ref.shape

    # First grid step: embedding LayerNorm initializes the carry.
    @pl.when(layer == 0)
    def _():
        x_sc[...] = _ln(emb_ref[...], eg_ref[...], eb_ref[...])

    x2d = x_sc[...]                                              # (B*S, H)

    # ---- QKV projections: single matmuls over the flattened batch*seq ----
    q = jnp.dot(x2d, wq_ref[...], preferred_element_type=jnp.float32) + bq_ref[...]
    k = jnp.dot(x2d, wk_ref[...], preferred_element_type=jnp.float32) + bk_ref[...]
    v = jnp.dot(x2d, wv_ref[...], preferred_element_type=jnp.float32) + bv_ref[...]

    # ---- head-batched attention over n = head*B + batch ----
    def split_heads(t):      # (B*S, H) -> (NUM_HEADS*B, S, HEAD_DIM), head-major
        return jnp.concatenate(
            [t[:, h * HEAD_DIM:(h + 1) * HEAD_DIM] for h in range(NUM_HEADS)],
            axis=0).reshape(NUM_HEADS * B, S, HEAD_DIM)

    qh, kh, vh = split_heads(q), split_heads(k), split_heads(v)
    s = jnp.einsum('nqd,nkd->nqk', qh, kh,
                   preferred_element_type=jnp.float32) * (HEAD_DIM ** -0.5)
    s = s + maskb_ref[...]                                       # (NH*B, 1, S) bias
    m = jnp.max(s, axis=-1, keepdims=True)
    p = jnp.exp(s - m)
    p = p * pl.reciprocal(jnp.sum(p, axis=-1, keepdims=True), approx=True)
    ctx = jnp.einsum('nqk,nkd->nqd', p, vh,
                     preferred_element_type=jnp.float32)         # (NH*B, S, hd)
    ctx2d = jnp.concatenate(
        [ctx[h * B:(h + 1) * B] for h in range(NUM_HEADS)], axis=-1
    ).reshape(B * S, H)

    # ---- output projection + residual LN, FFN + residual LN ----
    attn = jnp.dot(ctx2d, wo_ref[...], preferred_element_type=jnp.float32) + bo_ref[...]
    h1 = _ln(attn + x2d, g1_ref[...], be1_ref[...])
    inter = _gelu(jnp.dot(h1, wi_ref[...], preferred_element_type=jnp.float32)
                  + bi_ref[...])
    ffo = jnp.dot(inter, wf_ref[...], preferred_element_type=jnp.float32) + bf_ref[...]
    x_new = _ln(ffo + h1, g2_ref[...], be2_ref[...])
    x_sc[...] = x_new                                            # carry to next layer

    # Last grid step: emit hidden states + pooled (tanh of projected CLS token).
    @pl.when(layer == pl.num_programs(0) - 1)
    def _():
        x3 = x_new.reshape(B, S, H)
        hid_ref[...] = x3
        cls = x3[:, 0, :]                                        # (B, H)
        pooled_ref[...] = jnp.tanh(
            jnp.dot(cls, pw_ref[...], preferred_element_type=jnp.float32)
            + pb_ref[...])


# ------------------------------ wrapper -------------------------------------
def _rep(shape):
    nd = len(shape)
    return pl.BlockSpec(shape, lambda l, _n=nd: (0,) * _n)


def _per_layer(shape):
    nd = len(shape)
    return pl.BlockSpec((None,) + shape, lambda l, _n=nd: (l,) + (0,) * _n)


def pallas_bert_encoder(emb2d, mask_bias, params, B, S):
    lw = params['layers']      # dict of [NUM_LAYERS, ...] stacked arrays
    in_specs = [
        _rep((B * S, HIDDEN)),                                   # embeddings (pre-LN)
        _rep((NUM_HEADS * B, 1, S)),                             # additive mask bias
        _rep((1, HIDDEN)), _rep((1, HIDDEN)),                    # embedding LN g/b
        _per_layer((HIDDEN, HIDDEN)), _per_layer((1, HIDDEN)),   # wq, bq
        _per_layer((HIDDEN, HIDDEN)), _per_layer((1, HIDDEN)),   # wk, bk
        _per_layer((HIDDEN, HIDDEN)), _per_layer((1, HIDDEN)),   # wv, bv
        _per_layer((HIDDEN, HIDDEN)), _per_layer((1, HIDDEN)),   # wo, bo
        _per_layer((1, HIDDEN)), _per_layer((1, HIDDEN)),        # ln1 g/b
        _per_layer((HIDDEN, INTER)), _per_layer((1, INTER)),     # wi, bi
        _per_layer((INTER, HIDDEN)), _per_layer((1, HIDDEN)),    # wf, bf
        _per_layer((1, HIDDEN)), _per_layer((1, HIDDEN)),        # ln2 g/b
        _rep((HIDDEN, HIDDEN)), _rep((1, HIDDEN)),               # pooler w/b
    ]
    out_specs = [
        pl.BlockSpec((B, S, HIDDEN), lambda l: (0, 0, 0)),       # last_hidden_state
        pl.BlockSpec((B, HIDDEN), lambda l: (0, 0)),             # pooler_output
    ]
    args = (emb2d, mask_bias, params['emb_ln_g'], params['emb_ln_b'],
            lw['wq'], lw['bq'], lw['wk'], lw['bk'], lw['wv'], lw['bv'],
            lw['wo'], lw['bo'], lw['ln1_g'], lw['ln1_b'],
            lw['wi'], lw['bi'], lw['wf'], lw['bf'], lw['ln2_g'], lw['ln2_b'],
            params['pool_w'], params['pool_b'])
    hidden, pooled = pl.pallas_call(
        bert_encoder_kernel,
        out_shape=(jax.ShapeDtypeStruct((B, S, HIDDEN), jnp.float32),
                   jax.ShapeDtypeStruct((B, HIDDEN), jnp.float32)),
        grid_spec=pltpu.PrefetchScalarGridSpec(
            num_scalar_prefetch=0,
            grid=(NUM_LAYERS,),
            in_specs=in_specs,
            out_specs=out_specs,
            scratch_shapes=[pltpu.VMEM((B * S, HIDDEN), jnp.float32)]),
        compiler_params=pltpu.CompilerParams(
            dimension_semantics=("arbitrary",)),
    )(*args)
    return hidden, pooled


# -------------------------- parameter construction -------------------------
def init_params(key):
    def dense(k, din, dout):
        return (jax.random.normal(k, (din, dout), jnp.float32) * 0.02,
                jnp.zeros((1, dout), jnp.float32))

    keys = jax.random.split(key, 4 + NUM_LAYERS)
    params = {
        'word_emb': jax.random.normal(keys[0], (VOCAB, HIDDEN), jnp.float32) * 0.02,
        'pos_emb': jax.random.normal(keys[1], (MAX_POS, HIDDEN), jnp.float32) * 0.02,
        'type_emb': jax.random.normal(keys[2], (TYPE_VOCAB, HIDDEN), jnp.float32) * 0.02,
        'emb_ln_g': jnp.ones((1, HIDDEN), jnp.float32),
        'emb_ln_b': jnp.zeros((1, HIDDEN), jnp.float32),
    }
    params['pool_w'], params['pool_b'] = dense(keys[3], HIDDEN, HIDDEN)

    per_layer = []
    for l in range(NUM_LAYERS):
        lk = jax.random.split(keys[4 + l], 6)
        wq, bq = dense(lk[0], HIDDEN, HIDDEN)
        wk, bk = dense(lk[1], HIDDEN, HIDDEN)
        wv, bv = dense(lk[2], HIDDEN, HIDDEN)
        wo, bo = dense(lk[3], HIDDEN, HIDDEN)
        wi, bi = dense(lk[4], HIDDEN, INTER)
        wf, bf = dense(lk[5], INTER, HIDDEN)
        per_layer.append(dict(
            wq=wq, bq=bq, wk=wk, bk=bk, wv=wv, bv=bv, wo=wo, bo=bo,
            ln1_g=jnp.ones((1, HIDDEN), jnp.float32),
            ln1_b=jnp.zeros((1, HIDDEN), jnp.float32),
            wi=wi, bi=bi, wf=wf, bf=bf,
            ln2_g=jnp.ones((1, HIDDEN), jnp.float32),
            ln2_b=jnp.zeros((1, HIDDEN), jnp.float32)))
    # Stack per-layer weights into [NUM_LAYERS, ...] so the whole encoder can be
    # driven by a single pallas_call with grid=(NUM_LAYERS,).
    params['layers'] = {k: jnp.stack([lp[k] for lp in per_layer], axis=0)
                        for k in per_layer[0]}
    return params


# ------------------------------- forward -----------------------------------
def bert_classifier_embed_forward(params, input_ids, attention_mask):
    """Mirrors BertClassifierEmbed.forward: returns the raw BERT outputs dict."""
    B, S = input_ids.shape
    # Embedding gathers (data-dependent) in plain JAX; everything else is one fused kernel.
    emb = (params['word_emb'][input_ids]
           + params['pos_emb'][jnp.arange(S)][None, :, :]
           + params['type_emb'][0][None, None, :])      # TODO(synk): token_type_ids fixed to 0
    emb2d = emb.reshape(B * S, HIDDEN)

    # Precompute the additive attention bias once, replicated per head:
    # index n = head * B + batch, matching the kernel's head-major split.
    mask_bias = (1.0 - attention_mask.astype(jnp.float32)) * (-1e4)       # (B, S)
    mask_bias = jnp.broadcast_to(
        mask_bias[None, :, None, :], (NUM_HEADS, B, 1, S)
    ).reshape(NUM_HEADS * B, 1, S)

    hidden, pooled = pallas_bert_encoder(emb2d, mask_bias, params, B, S)
    return {'last_hidden_state': hidden, 'pooler_output': pooled}


if __name__ == "__main__":
    key = jax.random.PRNGKey(0)
    pkey, ikey = jax.random.split(key)
    params = init_params(pkey)

    B, S = 2, 8
    input_ids = jax.random.randint(ikey, (B, S), 0, VOCAB, dtype=jnp.int32)
    attention_mask = jnp.ones((B, S), jnp.int32).at[1, 6:].set(0)  # last 2 tokens of ex 1 padded

    out = bert_classifier_embed_forward(params, input_ids, attention_mask)
    jax.block_until_ready(out)
    assert out['last_hidden_state'].shape == (B, S, HIDDEN)
    assert out['pooler_output'].shape == (B, HIDDEN)
    print("KERNEL_OK")
</pallas_src>

<mosaic_0001>
module attributes {stable_mosaic.version = 11 : i64} {
  func.func @bert_encoder_kernel(%arg0: i32, %arg1: memref<16x32xf32, #tpu.memory_space<vmem>>, %arg2: memref<8x1x8xf32, #tpu.memory_space<vmem>>, %arg3: memref<1x32xf32, #tpu.memory_space<vmem>>, %arg4: memref<1x32xf32, #tpu.memory_space<vmem>>, %arg5: memref<1x32x32xf32, #tpu.memory_space<vmem>>, %arg6: memref<1x1x32xf32, #tpu.memory_space<vmem>>, %arg7: memref<1x32x32xf32, #tpu.memory_space<vmem>>, %arg8: memref<1x1x32xf32, #tpu.memory_space<vmem>>, %arg9: memref<1x32x32xf32, #tpu.memory_space<vmem>>, %arg10: memref<1x1x32xf32, #tpu.memory_space<vmem>>, %arg11: memref<1x32x32xf32, #tpu.memory_space<vmem>>, %arg12: memref<1x1x32xf32, #tpu.memory_space<vmem>>, %arg13: memref<1x1x32xf32, #tpu.memory_space<vmem>>, %arg14: memref<1x1x32xf32, #tpu.memory_space<vmem>>, %arg15: memref<1x32x64xf32, #tpu.memory_space<vmem>>, %arg16: memref<1x1x64xf32, #tpu.memory_space<vmem>>, %arg17: memref<1x64x32xf32, #tpu.memory_space<vmem>>, %arg18: memref<1x1x32xf32, #tpu.memory_space<vmem>>, %arg19: memref<1x1x32xf32, #tpu.memory_space<vmem>>, %arg20: memref<1x1x32xf32, #tpu.memory_space<vmem>>, %arg21: memref<32x32xf32, #tpu.memory_space<vmem>>, %arg22: memref<1x32xf32, #tpu.memory_space<vmem>>, %arg23: memref<2x8x32xf32, #tpu.memory_space<vmem>>, %arg24: memref<2x32xf32, #tpu.memory_space<vmem>>, %arg25: memref<16x32xf32, #tpu.memory_space<vmem>>) attributes {dimension_semantics = [#tpu.dimension_semantics<arbitrary>], iteration_bounds = array<i64: 2>, scalar_prefetch = 0 : i64, scratch_operands = 1 : i64, tpu.core_type = #tpu.core_type<tc>, window_params = [{pipeline_mode = #tpu.pipeline_mode<synchronous>, transform_indices = @transform_0, window_bounds = array<i64: 16, 32>}, {pipeline_mode = #tpu.pipeline_mode<synchronous>, transform_indices = @transform_1, window_bounds = array<i64: 8, 1, 8>}, {pipeline_mode = #tpu.pipeline_mode<synchronous>, transform_indices = @transform_2, window_bounds = array<i64: 1, 32>}, {pipeline_mode = #tpu.pipeline_mode<synchronous>, transform_indices = @transform_3, window_bounds = array<i64: 1, 32>}, {transform_indices = @transform_4, window_bounds = array<i64: 1, 32, 32>}, {transform_indices = @transform_5, window_bounds = array<i64: 1, 1, 32>}, {transform_indices = @transform_6, window_bounds = array<i64: 1, 32, 32>}, {transform_indices = @transform_7, window_bounds = array<i64: 1, 1, 32>}, {transform_indices = @transform_8, window_bounds = array<i64: 1, 32, 32>}, {transform_indices = @transform_9, window_bounds = array<i64: 1, 1, 32>}, {transform_indices = @transform_10, window_bounds = array<i64: 1, 32, 32>}, {transform_indices = @transform_11, window_bounds = array<i64: 1, 1, 32>}, {transform_indices = @transform_12, window_bounds = array<i64: 1, 1, 32>}, {transform_indices = @transform_13, window_bounds = array<i64: 1, 1, 32>}, {transform_indices = @transform_14, window_bounds = array<i64: 1, 32, 64>}, {transform_indices = @transform_15, window_bounds = array<i64: 1, 1, 64>}, {transform_indices = @transform_16, window_bounds = array<i64: 1, 64, 32>}, {transform_indices = @transform_17, window_bounds = array<i64: 1, 1, 32>}, {transform_indices = @transform_18, window_bounds = array<i64: 1, 1, 32>}, {transform_indices = @transform_19, window_bounds = array<i64: 1, 1, 32>}, {pipeline_mode = #tpu.pipeline_mode<synchronous>, transform_indices = @transform_20, window_bounds = array<i64: 32, 32>}, {pipeline_mode = #tpu.pipeline_mode<synchronous>, transform_indices = @transform_21, window_bounds = array<i64: 1, 32>}, {pipeline_mode = #tpu.pipeline_mode<synchronous>, transform_indices = @transform_22, window_bounds = array<i64: 2, 8, 32>}, {pipeline_mode = #tpu.pipeline_mode<synchronous>, transform_indices = @transform_23, window_bounds = array<i64: 2, 32>}]} {
    %c0_i32 = arith.constant 0 : i32
    %0 = arith.cmpi eq, %arg0, %c0_i32 : i32
    %1 = arith.extui %0 : i1 to i32
    %c0_i32_0 = arith.constant 0 : i32
    %2 = arith.cmpi ne, %1, %c0_i32_0 : i32
    scf.if %2 {
      %c0_80 = arith.constant 0 : index
      %c0_81 = arith.constant 0 : index
      %158 = vector.load %arg1[%c0_80, %c0_81] : memref<16x32xf32, #tpu.memory_space<vmem>>, vector<16x32xf32>
      %c0_82 = arith.constant 0 : index
      %c0_83 = arith.constant 0 : index
      %159 = vector.load %arg3[%c0_82, %c0_83] : memref<1x32xf32, #tpu.memory_space<vmem>>, vector<1x32xf32>
      %c0_84 = arith.constant 0 : index
      %c0_85 = arith.constant 0 : index
      %160 = vector.load %arg4[%c0_84, %c0_85] : memref<1x32xf32, #tpu.memory_space<vmem>>, vector<1x32xf32>
      %cst_86 = arith.constant dense<0.000000e+00> : vector<16xf32>
      %161 = vector.multi_reduction <add>, %158, %cst_86 [1] : vector<16x32xf32> to vector<16xf32>
      %162 = vector.shape_cast %161 : vector<16xf32> to vector<16x1xf32>
      %cst_87 = arith.constant 3.200000e+01 : f32
      %163 = vector.broadcast %cst_87 : f32 to vector<16x1xf32>
      %164 = arith.divf %162, %163 : vector<16x1xf32>
      %165 = vector.broadcast %164 : vector<16x1xf32> to vector<16x32xf32>
      %166 = arith.subf %158, %165 : vector<16x32xf32>
      %167 = arith.mulf %166, %166 : vector<16x32xf32>
      %cst_88 = arith.constant dense<0.000000e+00> : vector<16xf32>
      %168 = vector.multi_reduction <add>, %167, %cst_88 [1] : vector<16x32xf32> to vector<16xf32>
      %169 = vector.shape_cast %168 : vector<16xf32> to vector<16x1xf32>
      %cst_89 = arith.constant 3.200000e+01 : f32
      %170 = vector.broadcast %cst_89 : f32 to vector<16x1xf32>
      %171 = arith.divf %169, %170 : vector<16x1xf32>
      %172 = vector.broadcast %164 : vector<16x1xf32> to vector<16x32xf32>
      %173 = arith.subf %158, %172 : vector<16x32xf32>
      %cst_90 = arith.constant 9.99999996E-13 : f32
      %174 = vector.broadcast %cst_90 : f32 to vector<16x1xf32>
      %175 = arith.addf %171, %174 : vector<16x1xf32>
      %176 = math.rsqrt %175 : vector<16x1xf32>
      %177 = vector.broadcast %176 : vector<16x1xf32> to vector<16x32xf32>
      %178 = arith.mulf %173, %177 : vector<16x32xf32>
      %179 = vector.broadcast %159 : vector<1x32xf32> to vector<16x32xf32>
      %180 = arith.mulf %178, %179 : vector<16x32xf32>
      %181 = vector.broadcast %160 : vector<1x32xf32> to vector<16x32xf32>
      %182 = arith.addf %180, %181 : vector<16x32xf32>
      %c0_91 = arith.constant 0 : index
      %c0_92 = arith.constant 0 : index
      %183 = vector.load %arg25[%c0_91, %c0_92] : memref<16x32xf32, #tpu.memory_space<vmem>>, vector<16x32xf32>
      tpu.vector_store %arg25[%c0_91, %c0_92], %182 {strides = array<i32>} : memref<16x32xf32, #tpu.memory_space<vmem>>, vector<16x32xf32>,
    } else {
    }
    %c0 = arith.constant 0 : index
    %c0_1 = arith.constant 0 : index
    %3 = vector.load %arg25[%c0, %c0_1] : memref<16x32xf32, #tpu.memory_space<vmem>>, vector<16x32xf32>
    %c0_2 = arith.constant 0 : index
    %c0_3 = arith.constant 0 : index
    %c0_4 = arith.constant 0 : index
    %4 = vector.load %arg5[%c0_2, %c0_3, %c0_4] : memref<1x32x32xf32, #tpu.memory_space<vmem>>, vector<1x32x32xf32>
    %5 = vector.shape_cast %4 : vector<1x32x32xf32> to vector<32x32xf32>
    %cst = arith.constant dense<0.000000e+00> : vector<16x32xf32>
    %6 = tpu.matmul %3, %5, %cst {dimension_numbers = #tpu.dot_dimension_numbers<[1], [0], [0], [1], [0, 0, 1, 1], [], []>} : vector<16x32xf32>, vector<32x32xf32>, vector<16x32xf32> -> vector<16x32xf32>
    %c0_5 = arith.constant 0 : index
    %c0_6 = arith.constant 0 : index
    %c0_7 = arith.constant 0 : index
    %7 = vector.load %arg6[%c0_5, %c0_6, %c0_7] : memref<1x1x32xf32, #tpu.memory_space<vmem>>, vector<1x1x32xf32>
    %8 = vector.shape_cast %7 : vector<1x1x32xf32> to vector<1x32xf32>
    %9 = vector.broadcast %8 : vector<1x32xf32> to vector<16x32xf32>
    %10 = arith.addf %6, %9 : vector<16x32xf32>
    %c0_8 = arith.constant 0 : index
    %c0_9 = arith.constant 0 : index
    %c0_10 = arith.constant 0 : index
    %11 = vector.load %arg7[%c0_8, %c0_9, %c0_10] : memref<1x32x32xf32, #tpu.memory_space<vmem>>, vector<1x32x32xf32>
    %12 = vector.shape_cast %11 : vector<1x32x32xf32> to vector<32x32xf32>
    %cst_11 = arith.constant dense<0.000000e+00> : vector<16x32xf32>
    %13 = tpu.matmul %3, %12, %cst_11 {dimension_numbers = #tpu.dot_dimension_numbers<[1], [0], [0], [1], [0, 0, 1, 1], [], []>} : vector<16x32xf32>, vector<32x32xf32>, vector<16x32xf32> -> vector<16x32xf32>
    %c0_12 = arith.constant 0 : index
    %c0_13 = arith.constant 0 : index
    %c0_14 = arith.constant 0 : index
    %14 = vector.load %arg8[%c0_12, %c0_13, %c0_14] : memref<1x1x32xf32, #tpu.memory_space<vmem>>, vector<1x1x32xf32>
    %15 = vector.shape_cast %14 : vector<1x1x32xf32> to vector<1x32xf32>
    %16 = vector.broadcast %15 : vector<1x32xf32> to vector<16x32xf32>
    %17 = arith.addf %13, %16 : vector<16x32xf32>
    %c0_15 = arith.constant 0 : index
    %c0_16 = arith.constant 0 : index
    %c0_17 = arith.constant 0 : index
    %18 = vector.load %arg9[%c0_15, %c0_16, %c0_17] : memref<1x32x32xf32, #tpu.memory_space<vmem>>, vector<1x32x32xf32>
    %19 = vector.shape_cast %18 : vector<1x32x32xf32> to vector<32x32xf32>
    %cst_18 = arith.constant dense<0.000000e+00> : vector<16x32xf32>
    %20 = tpu.matmul %3, %19, %cst_18 {dimension_numbers = #tpu.dot_dimension_numbers<[1], [0], [0], [1], [0, 0, 1, 1], [], []>} : vector<16x32xf32>, vector<32x32xf32>, vector<16x32xf32> -> vector<16x32xf32>
    %c0_19 = arith.constant 0 : index
    %c0_20 = arith.constant 0 : index
    %c0_21 = arith.constant 0 : index
    %21 = vector.load %arg10[%c0_19, %c0_20, %c0_21] : memref<1x1x32xf32, #tpu.memory_space<vmem>>, vector<1x1x32xf32>
    %22 = vector.shape_cast %21 : vector<1x1x32xf32> to vector<1x32xf32>
    %23 = vector.broadcast %22 : vector<1x32xf32> to vector<16x32xf32>
    %24 = arith.addf %20, %23 : vector<16x32xf32>
    %25 = vector.extract_strided_slice %10 {offsets = [0, 0], sizes = [16, 8], strides = [1, 1]} : vector<16x32xf32> to vector<16x8xf32>
    %26 = vector.extract_strided_slice %10 {offsets = [0, 8], sizes = [16, 8], strides = [1, 1]} : vector<16x32xf32> to vector<16x8xf32>
    %27 = vector.extract_strided_slice %10 {offsets = [0, 16], sizes = [16, 8], strides = [1, 1]} : vector<16x32xf32> to vector<16x8xf32>
    %28 = vector.extract_strided_slice %10 {offsets = [0, 24], sizes = [16, 8], strides = [1, 1]} : vector<16x32xf32> to vector<16x8xf32>
    %29 = tpu.concatenate %25, %26, %27, %28 in 0 : vector<16x8xf32>, vector<16x8xf32>, vector<16x8xf32>, vector<16x8xf32> -> vector<64x8xf32>
    %30 = vector.shape_cast %29 : vector<64x8xf32> to vector<8x8x8xf32>
    %31 = vector.extract_strided_slice %17 {offsets = [0, 0], sizes = [16, 8], strides = [1, 1]} : vector<16x32xf32> to vector<16x8xf32>
    %32 = vector.extract_strided_slice %17 {offsets = [0, 8], sizes = [16, 8], strides = [1, 1]} : vector<16x32xf32> to vector<16x8xf32>
    %33 = vector.extract_strided_slice %17 {offsets = [0, 16], sizes = [16, 8], strides = [1, 1]} : vector<16x32xf32> to vector<16x8xf32>
    %34 = vector.extract_strided_slice %17 {offsets = [0, 24], sizes = [16, 8], strides = [1, 1]} : vector<16x32xf32> to vector<16x8xf32>
    %35 = tpu.concatenate %31, %32, %33, %34 in 0 : vector<16x8xf32>, vector<16x8xf32>, vector<16x8xf32>, vector<16x8xf32> -> vector<64x8xf32>
    %36 = vector.shape_cast %35 : vector<64x8xf32> to vector<8x8x8xf32>
    %37 = vector.extract_strided_slice %24 {offsets = [0, 0], sizes = [16, 8], strides = [1, 1]} : vector<16x32xf32> to vector<16x8xf32>
    %38 = vector.extract_strided_slice %24 {offsets = [0, 8], sizes = [16, 8], strides = [1, 1]} : vector<16x32xf32> to vector<16x8xf32>
    %39 = vector.extract_strided_slice %24 {offsets = [0, 16], sizes = [16, 8], strides = [1, 1]} : vector<16x32xf32> to vector<16x8xf32>
    %40 = vector.extract_strided_slice %24 {offsets = [0, 24], sizes = [16, 8], strides = [1, 1]} : vector<16x32xf32> to vector<16x8xf32>
    %41 = tpu.concatenate %37, %38, %39, %40 in 0 : vector<16x8xf32>, vector<16x8xf32>, vector<16x8xf32>, vector<16x8xf32> -> vector<64x8xf32>
    %42 = vector.shape_cast %41 : vector<64x8xf32> to vector<8x8x8xf32>
    "tpu.trace_start"() <{level = 10 : i32, message = "nqd,nkd->nqk"}> : () -> ()
    %cst_22 = arith.constant dense<0.000000e+00> : vector<8x8x8xf32>
    %43 = tpu.matmul %30, %36, %cst_22 {dimension_numbers = #tpu.dot_dimension_numbers<[2], [2], [1], [1], [0, 0, 0, 1, 1, 1], [0], [0]>} : vector<8x8x8xf32>, vector<8x8x8xf32>, vector<8x8x8xf32> -> vector<8x8x8xf32>
    "tpu.trace_stop"() : () -> ()
    %cst_23 = arith.constant 0.353553385 : f32
    %44 = vector.broadcast %cst_23 : f32 to vector<8x8x8xf32>
    %45 = arith.mulf %43, %44 : vector<8x8x8xf32>
    %c0_24 = arith.constant 0 : index
    %c0_25 = arith.constant 0 : index
    %c0_26 = arith.constant 0 : index
    %46 = vector.load %arg2[%c0_24, %c0_25, %c0_26] : memref<8x1x8xf32, #tpu.memory_space<vmem>>, vector<8x1x8xf32>
    %47 = vector.broadcast %46 : vector<8x1x8xf32> to vector<8x8x8xf32>
    %48 = arith.addf %45, %47 : vector<8x8x8xf32>
    %cst_27 = arith.constant dense<0xFF800000> : vector<8x8xf32>
    %49 = vector.multi_reduction <maximumf>, %48, %cst_27 [2] : vector<8x8x8xf32> to vector<8x8xf32>
    %50 = vector.shape_cast %49 : vector<8x8xf32> to vector<8x8x1xf32>
    %51 = vector.broadcast %50 : vector<8x8x1xf32> to vector<8x8x8xf32>
    %52 = arith.subf %48, %51 : vector<8x8x8xf32>
    %53 = math.exp %52 : vector<8x8x8xf32>
    %cst_28 = arith.constant dense<0.000000e+00> : vector<8x8xf32>
    %54 = vector.multi_reduction <add>, %53, %cst_28 [2] : vector<8x8x8xf32> to vector<8x8xf32>
    %55 = vector.shape_cast %54 : vector<8x8xf32> to vector<8x8x1xf32>
    %56 = tpu.reciprocal %55 {approx = true} : vector<8x8x1xf32> -> vector<8x8x1xf32>
    %57 = vector.broadcast %56 : vector<8x8x1xf32> to vector<8x8x8xf32>
    %58 = arith.mulf %53, %57 : vector<8x8x8xf32>
    "tpu.trace_start"() <{level = 10 : i32, message = "nqk,nkd->nqd"}> : () -> ()
    %cst_29 = arith.constant dense<0.000000e+00> : vector<8x8x8xf32>
    %59 = tpu.matmul %58, %42, %cst_29 {dimension_numbers = #tpu.dot_dimension_numbers<[2], [1], [1], [2], [0, 0, 0, 1, 1, 2], [0], [0]>} : vector<8x8x8xf32>, vector<8x8x8xf32>, vector<8x8x8xf32> -> vector<8x8x8xf32>
    "tpu.trace_stop"() : () -> ()
    %60 = vector.extract_strided_slice %59 {offsets = [0, 0, 0], sizes = [2, 8, 8], strides = [1, 1, 1]} : vector<8x8x8xf32> to vector<2x8x8xf32>
    %61 = vector.extract_strided_slice %59 {offsets = [2, 0, 0], sizes = [2, 8, 8], strides = [1, 1, 1]} : vector<8x8x8xf32> to vector<2x8x8xf32>
    %62 = vector.extract_strided_slice %59 {offsets = [4, 0, 0], sizes = [2, 8, 8], strides = [1, 1, 1]} : vector<8x8x8xf32> to vector<2x8x8xf32>
    %63 = vector.extract_strided_slice %59 {offsets = [6, 0, 0], sizes = [2, 8, 8], strides = [1, 1, 1]} : vector<8x8x8xf32> to vector<2x8x8xf32>
    %64 = tpu.concatenate %60, %61, %62, %63 in 2 : vector<2x8x8xf32>, vector<2x8x8xf32>, vector<2x8x8xf32>, vector<2x8x8xf32> -> vector<2x8x32xf32>
    %65 = vector.shape_cast %64 : vector<2x8x32xf32> to vector<16x32xf32>
    %c0_30 = arith.constant 0 : index
    %c0_31 = arith.constant 0 : index
    %c0_32 = arith.constant 0 : index
    %66 = vector.load %arg11[%c0_30, %c0_31, %c0_32] : memref<1x32x32xf32, #tpu.memory_space<vmem>>, vector<1x32x32xf32>
    %67 = vector.shape_cast %66 : vector<1x32x32xf32> to vector<32x32xf32>
    %cst_33 = arith.constant dense<0.000000e+00> : vector<16x32xf32>
    %68 = tpu.matmul %65, %67, %cst_33 {dimension_numbers = #tpu.dot_dimension_numbers<[1], [0], [0], [1], [0, 0, 1, 1], [], []>} : vector<16x32xf32>, vector<32x32xf32>, vector<16x32xf32> -> vector<16x32xf32>
    %c0_34 = arith.constant 0 : index
    %c0_35 = arith.constant 0 : index
    %c0_36 = arith.constant 0 : index
    %69 = vector.load %arg12[%c0_34, %c0_35, %c0_36] : memref<1x1x32xf32, #tpu.memory_space<vmem>>, vector<1x1x32xf32>
    %70 = vector.shape_cast %69 : vector<1x1x32xf32> to vector<1x32xf32>
    %71 = vector.broadcast %70 : vector<1x32xf32> to vector<16x32xf32>
    %72 = arith.addf %68, %71 : vector<16x32xf32>
    %73 = arith.addf %72, %3 : vector<16x32xf32>
    %c0_37 = arith.constant 0 : index
    %c0_38 = arith.constant 0 : index
    %c0_39 = arith.constant 0 : index
    %74 = vector.load %arg13[%c0_37, %c0_38, %c0_39] : memref<1x1x32xf32, #tpu.memory_space<vmem>>, vector<1x1x32xf32>
    %75 = vector.shape_cast %74 : vector<1x1x32xf32> to vector<1x32xf32>
    %c0_40 = arith.constant 0 : index
    %c0_41 = arith.constant 0 : index
    %c0_42 = arith.constant 0 : index
    %76 = vector.load %arg14[%c0_40, %c0_41, %c0_42] : memref<1x1x32xf32, #tpu.memory_space<vmem>>, vector<1x1x32xf32>
    %77 = vector.shape_cast %76 : vector<1x1x32xf32> to vector<1x32xf32>
    %cst_43 = arith.constant dense<0.000000e+00> : vector<16xf32>
    %78 = vector.multi_reduction <add>, %73, %cst_43 [1] : vector<16x32xf32> to vector<16xf32>
    %79 = vector.shape_cast %78 : vector<16xf32> to vector<16x1xf32>
    %cst_44 = arith.constant 3.200000e+01 : f32
    %80 = vector.broadcast %cst_44 : f32 to vector<16x1xf32>
    %81 = arith.divf %79, %80 : vector<16x1xf32>
    %82 = vector.broadcast %81 : vector<16x1xf32> to vector<16x32xf32>
    %83 = arith.subf %73, %82 : vector<16x32xf32>
    %84 = arith.mulf %83, %83 : vector<16x32xf32>
    %cst_45 = arith.constant dense<0.000000e+00> : vector<16xf32>
    %85 = vector.multi_reduction <add>, %84, %cst_45 [1] : vector<16x32xf32> to vector<16xf32>
    %86 = vector.shape_cast %85 : vector<16xf32> to vector<16x1xf32>
    %cst_46 = arith.constant 3.200000e+01 : f32
    %87 = vector.broadcast %cst_46 : f32 to vector<16x1xf32>
    %88 = arith.divf %86, %87 : vector<16x1xf32>
    %89 = vector.broadcast %81 : vector<16x1xf32> to vector<16x32xf32>
    %90 = arith.subf %73, %89 : vector<16x32xf32>
    %cst_47 = arith.constant 9.99999996E-13 : f32
    %91 = vector.broadcast %cst_47 : f32 to vector<16x1xf32>
    %92 = arith.addf %88, %91 : vector<16x1xf32>
    %93 = math.rsqrt %92 : vector<16x1xf32>
    %94 = vector.broadcast %93 : vector<16x1xf32> to vector<16x32xf32>
    %95 = arith.mulf %90, %94 : vector<16x32xf32>
    %96 = vector.broadcast %75 : vector<1x32xf32> to vector<16x32xf32>
    %97 = arith.mulf %95, %96 : vector<16x32xf32>
    %98 = vector.broadcast %77 : vector<1x32xf32> to vector<16x32xf32>
    %99 = arith.addf %97, %98 : vector<16x32xf32>
    %c0_48 = arith.constant 0 : index
    %c0_49 = arith.constant 0 : index
    %c0_50 = arith.constant 0 : index
    %100 = vector.load %arg15[%c0_48, %c0_49, %c0_50] : memref<1x32x64xf32, #tpu.memory_space<vmem>>, vector<1x32x64xf32>
    %101 = vector.shape_cast %100 : vector<1x32x64xf32> to vector<32x64xf32>
    %cst_51 = arith.constant dense<0.000000e+00> : vector<16x64xf32>
    %102 = tpu.matmul %99, %101, %cst_51 {dimension_numbers = #tpu.dot_dimension_numbers<[1], [0], [0], [1], [0, 0, 1, 1], [], []>} : vector<16x32xf32>, vector<32x64xf32>, vector<16x64xf32> -> vector<16x64xf32>
    %c0_52 = arith.constant 0 : index
    %c0_53 = arith.constant 0 : index
    %c0_54 = arith.constant 0 : index
    %103 = vector.load %arg16[%c0_52, %c0_53, %c0_54] : memref<1x1x64xf32, #tpu.memory_space<vmem>>, vector<1x1x64xf32>
    %104 = vector.shape_cast %103 : vector<1x1x64xf32> to vector<1x64xf32>
    %105 = vector.broadcast %104 : vector<1x64xf32> to vector<16x64xf32>
    %106 = arith.addf %102, %105 : vector<16x64xf32>
    %cst_55 = arith.constant 5.000000e-01 : f32
    %107 = vector.broadcast %cst_55 : f32 to vector<16x64xf32>
    %108 = arith.mulf %107, %106 : vector<16x64xf32>
    %cst_56 = arith.constant 4.471500e-02 : f32
    %109 = vector.broadcast %cst_56 : f32 to vector<16x64xf32>
    %110 = arith.mulf %109, %106 : vector<16x64xf32>
    %111 = arith.mulf %110, %106 : vector<16x64xf32>
    %112 = arith.mulf %111, %106 : vector<16x64xf32>
    %113 = arith.addf %106, %112 : vector<16x64xf32>
    %cst_57 = arith.constant 0.797884583 : f32
    %114 = vector.broadcast %cst_57 : f32 to vector<16x64xf32>
    %115 = arith.mulf %114, %113 : vector<16x64xf32>
    %116 = math.tanh %115 : vector<16x64xf32>
    %cst_58 = arith.constant 1.000000e+00 : f32
    %117 = vector.broadcast %cst_58 : f32 to vector<16x64xf32>
    %118 = arith.addf %117, %116 : vector<16x64xf32>
    %119 = arith.mulf %108, %118 : vector<16x64xf32>
    %c0_59 = arith.constant 0 : index
    %c0_60 = arith.constant 0 : index
    %c0_61 = arith.constant 0 : index
    %120 = vector.load %arg17[%c0_59, %c0_60, %c0_61] : memref<1x64x32xf32, #tpu.memory_space<vmem>>, vector<1x64x32xf32>
    %121 = vector.shape_cast %120 : vector<1x64x32xf32> to vector<64x32xf32>
    %cst_62 = arith.constant dense<0.000000e+00> : vector<16x32xf32>
    %122 = tpu.matmul %119, %121, %cst_62 {dimension_numbers = #tpu.dot_dimension_numbers<[1], [0], [0], [1], [0, 0, 1, 1], [], []>} : vector<16x64xf32>, vector<64x32xf32>, vector<16x32xf32> -> vector<16x32xf32>
    %c0_63 = arith.constant 0 : index
    %c0_64 = arith.constant 0 : index
    %c0_65 = arith.constant 0 : index
    %123 = vector.load %arg18[%c0_63, %c0_64, %c0_65] : memref<1x1x32xf32, #tpu.memory_space<vmem>>, vector<1x1x32xf32>
    %124 = vector.shape_cast %123 : vector<1x1x32xf32> to vector<1x32xf32>
    %125 = vector.broadcast %124 : vector<1x32xf32> to vector<16x32xf32>
    %126 = arith.addf %122, %125 : vector<16x32xf32>
    %127 = arith.addf %126, %99 : vector<16x32xf32>
    %c0_66 = arith.constant 0 : index
    %c0_67 = arith.constant 0 : index
    %c0_68 = arith.constant 0 : index
    %128 = vector.load %arg19[%c0_66, %c0_67, %c0_68] : memref<1x1x32xf32, #tpu.memory_space<vmem>>, vector<1x1x32xf32>
    %129 = vector.shape_cast %128 : vector<1x1x32xf32> to vector<1x32xf32>
    %c0_69 = arith.constant 0 : index
    %c0_70 = arith.constant 0 : index
    %c0_71 = arith.constant 0 : index
    %130 = vector.load %arg20[%c0_69, %c0_70, %c0_71] : memref<1x1x32xf32, #tpu.memory_space<vmem>>, vector<1x1x32xf32>
    %131 = vector.shape_cast %130 : vector<1x1x32xf32> to vector<1x32xf32>
    %cst_72 = arith.constant dense<0.000000e+00> : vector<16xf32>
    %132 = vector.multi_reduction <add>, %127, %cst_72 [1] : vector<16x32xf32> to vector<16xf32>
    %133 = vector.shape_cast %132 : vector<16xf32> to vector<16x1xf32>
    %cst_73 = arith.constant 3.200000e+01 : f32
    %134 = vector.broadcast %cst_73 : f32 to vector<16x1xf32>
    %135 = arith.divf %133, %134 : vector<16x1xf32>
    %136 = vector.broadcast %135 : vector<16x1xf32> to vector<16x32xf32>
    %137 = arith.subf %127, %136 : vector<16x32xf32>
    %138 = arith.mulf %137, %137 : vector<16x32xf32>
    %cst_74 = arith.constant dense<0.000000e+00> : vector<16xf32>
    %139 = vector.multi_reduction <add>, %138, %cst_74 [1] : vector<16x32xf32> to vector<16xf32>
    %140 = vector.shape_cast %139 : vector<16xf32> to vector<16x1xf32>
    %cst_75 = arith.constant 3.200000e+01 : f32
    %141 = vector.broadcast %cst_75 : f32 to vector<16x1xf32>
    %142 = arith.divf %140, %141 : vector<16x1xf32>
    %143 = vector.broadcast %135 : vector<16x1xf32> to vector<16x32xf32>
    %144 = arith.subf %127, %143 : vector<16x32xf32>
    %cst_76 = arith.constant 9.99999996E-13 : f32
    %145 = vector.broadcast %cst_76 : f32 to vector<16x1xf32>
    %146 = arith.addf %142, %145 : vector<16x1xf32>
    %147 = math.rsqrt %146 : vector<16x1xf32>
    %148 = vector.broadcast %147 : vector<16x1xf32> to vector<16x32xf32>
    %149 = arith.mulf %144, %148 : vector<16x32xf32>
    %150 = vector.broadcast %129 : vector<1x32xf32> to vector<16x32xf32>
    %151 = arith.mulf %149, %150 : vector<16x32xf32>
    %152 = vector.broadcast %131 : vector<1x32xf32> to vector<16x32xf32>
    %153 = arith.addf %151, %152 : vector<16x32xf32>
    %c0_77 = arith.constant 0 : index
    %c0_78 = arith.constant 0 : index
    %154 = vector.load %arg25[%c0_77, %c0_78] : memref<16x32xf32, #tpu.memory_space<vmem>>, vector<16x32xf32>
    tpu.vector_store %arg25[%c0_77, %c0_78], %153 {strides = array<i32>} : memref<16x32xf32, #tpu.memory_space<vmem>>, vector<16x32xf32>,
    %c1_i32 = arith.constant 1 : i32
    %155 = arith.cmpi eq, %arg0, %c1_i32 : i32
    %156 = arith.extui %155 : i1 to i32
    %c0_i32_79 = arith.constant 0 : i32
    %157 = arith.cmpi ne, %156, %c0_i32_79 : i32
    scf.if %157 {
      %158 = vector.shape_cast %153 : vector<16x32xf32> to vector<2x8x32xf32>
      %c0_80 = arith.constant 0 : index
      %c0_81 = arith.constant 0 : index
      %c0_82 = arith.constant 0 : index
      %159 = vector.load %arg23[%c0_80, %c0_81, %c0_82] : memref<2x8x32xf32, #tpu.memory_space<vmem>>, vector<2x8x32xf32>
      tpu.vector_store %arg23[%c0_80, %c0_81, %c0_82], %158 {strides = array<i32>} : memref<2x8x32xf32, #tpu.memory_space<vmem>>, vector<2x8x32xf32>,
      %160 = vector.extract_strided_slice %158 {offsets = [0, 0, 0], sizes = [2, 1, 32], strides = [1, 1, 1]} : vector<2x8x32xf32> to vector<2x1x32xf32>
      %161 = vector.shape_cast %160 : vector<2x1x32xf32> to vector<2x32xf32>
      %c0_83 = arith.constant 0 : index
      %c0_84 = arith.constant 0 : index
      %162 = vector.load %arg21[%c0_83, %c0_84] : memref<32x32xf32, #tpu.memory_space<vmem>>, vector<32x32xf32>
      %cst_85 = arith.constant dense<0.000000e+00> : vector<2x32xf32>
      %163 = tpu.matmul %161, %162, %cst_85 {dimension_numbers = #tpu.dot_dimension_numbers<[1], [0], [0], [1], [0, 0, 1, 1], [], []>} : vector<2x32xf32>, vector<32x32xf32>, vector<2x32xf32> -> vector<2x32xf32>
      %c0_86 = arith.constant 0 : index
      %c0_87 = arith.constant 0 : index
      %164 = vector.load %arg22[%c0_86, %c0_87] : memref<1x32xf32, #tpu.memory_space<vmem>>, vector<1x32xf32>
      %165 = vector.broadcast %164 : vector<1x32xf32> to vector<2x32xf32>
      %166 = arith.addf %163, %165 : vector<2x32xf32>
      %167 = math.tanh %166 : vector<2x32xf32>
      %c0_88 = arith.constant 0 : index
      %c0_89 = arith.constant 0 : index
      %168 = vector.load %arg24[%c0_88, %c0_89] : memref<2x32xf32, #tpu.memory_space<vmem>>, vector<2x32xf32>
      tpu.vector_store %arg24[%c0_88, %c0_89], %167 {strides = array<i32>} : memref<2x32xf32, #tpu.memory_space<vmem>>, vector<2x32xf32>,
    } else {
    }
    return
  }
  func.func @transform_0(%arg0: i32) -> (i32, i32) {
    %c0_i32 = arith.constant 0 : i32
    %c0_i32_0 = arith.constant 0 : i32
    %c0_i32_1 = arith.constant 0 : i32
    return %c0_i32, %c0_i32_0 : i32, i32
  }
  func.func @transform_1(%arg0: i32) -> (i32, i32, i32) {
    %c0_i32 = arith.constant 0 : i32
    %c0_i32_0 = arith.constant 0 : i32
    %c0_i32_1 = arith.constant 0 : i32
    %c0_i32_2 = arith.constant 0 : i32
    return %c0_i32, %c0_i32_0, %c0_i32_1 : i32, i32, i32
  }
  func.func @transform_2(%arg0: i32) -> (i32, i32) {
    %c0_i32 = arith.constant 0 : i32
    %c0_i32_0 = arith.constant 0 : i32
    %c0_i32_1 = arith.constant 0 : i32
    return %c0_i32, %c0_i32_0 : i32, i32
  }
  func.func @transform_3(%arg0: i32) -> (i32, i32) {
    %c0_i32 = arith.constant 0 : i32
    %c0_i32_0 = arith.constant 0 : i32
    %c0_i32_1 = arith.constant 0 : i32
    return %c0_i32, %c0_i32_0 : i32, i32
  }
  func.func @transform_4(%arg0: i32) -> (i32, i32, i32) {
    %c0_i32 = arith.constant 0 : i32
    %c0_i32_0 = arith.constant 0 : i32
    %c0_i32_1 = arith.constant 0 : i32
    return %arg0, %c0_i32, %c0_i32_0 : i32, i32, i32
  }
  func.func @transform_5(%arg0: i32) -> (i32, i32, i32) {
    %c0_i32 = arith.constant 0 : i32
    %c0_i32_0 = arith.constant 0 : i32
    %c0_i32_1 = arith.constant 0 : i32
    return %arg0, %c0_i32, %c0_i32_0 : i32, i32, i32
  }
  func.func @transform_6(%arg0: i32) -> (i32, i32, i32) {
    %c0_i32 = arith.constant 0 : i32
    %c0_i32_0 = arith.constant 0 : i32
    %c0_i32_1 = arith.constant 0 : i32
    return %arg0, %c0_i32, %c0_i32_0 : i32, i32, i32
  }
  func.func @transform_7(%arg0: i32) -> (i32, i32, i32) {
    %c0_i32 = arith.constant 0 : i32
    %c0_i32_0 = arith.constant 0 : i32
    %c0_i32_1 = arith.constant 0 : i32
    return %arg0, %c0_i32, %c0_i32_0 : i32, i32, i32
  }
  func.func @transform_8(%arg0: i32) -> (i32, i32, i32) {
    %c0_i32 = arith.constant 0 : i32
    %c0_i32_0 = arith.constant 0 : i32
    %c0_i32_1 = arith.constant 0 : i32
    return %arg0, %c0_i32, %c0_i32_0 : i32, i32, i32
  }
  func.func @transform_9(%arg0: i32) -> (i32, i32, i32) {
    %c0_i32 = arith.constant 0 : i32
    %c0_i32_0 = arith.constant 0 : i32
    %c0_i32_1 = arith.constant 0 : i32
    return %arg0, %c0_i32, %c0_i32_0 : i32, i32, i32
  }
  func.func @transform_10(%arg0: i32) -> (i32, i32, i32) {
    %c0_i32 = arith.constant 0 : i32
    %c0_i32_0 = arith.constant 0 : i32
    %c0_i32_1 = arith.constant 0 : i32
    return %arg0, %c0_i32, %c0_i32_0 : i32, i32, i32
  }
  func.func @transform_11(%arg0: i32) -> (i32, i32, i32) {
    %c0_i32 = arith.constant 0 : i32
    %c0_i32_0 = arith.constant 0 : i32
    %c0_i32_1 = arith.constant 0 : i32
    return %arg0, %c0_i32, %c0_i32_0 : i32, i32, i32
  }
  func.func @transform_12(%arg0: i32) -> (i32, i32, i32) {
    %c0_i32 = arith.constant 0 : i32
    %c0_i32_0 = arith.constant 0 : i32
    %c0_i32_1 = arith.constant 0 : i32
    return %arg0, %c0_i32, %c0_i32_0 : i32, i32, i32
  }
  func.func @transform_13(%arg0: i32) -> (i32, i32, i32) {
    %c0_i32 = arith.constant 0 : i32
    %c0_i32_0 = arith.constant 0 : i32
    %c0_i32_1 = arith.constant 0 : i32
    return %arg0, %c0_i32, %c0_i32_0 : i32, i32, i32
  }
  func.func @transform_14(%arg0: i32) -> (i32, i32, i32) {
    %c0_i32 = arith.constant 0 : i32
    %c0_i32_0 = arith.constant 0 : i32
    %c0_i32_1 = arith.constant 0 : i32
    return %arg0, %c0_i32, %c0_i32_0 : i32, i32, i32
  }
  func.func @transform_15(%arg0: i32) -> (i32, i32, i32) {
    %c0_i32 = arith.constant 0 : i32
    %c0_i32_0 = arith.constant 0 : i32
    %c0_i32_1 = arith.constant 0 : i32
    return %arg0, %c0_i32, %c0_i32_0 : i32, i32, i32
  }
  func.func @transform_16(%arg0: i32) -> (i32, i32, i32) {
    %c0_i32 = arith.constant 0 : i32
    %c0_i32_0 = arith.constant 0 : i32
    %c0_i32_1 = arith.constant 0 : i32
    return %arg0, %c0_i32, %c0_i32_0 : i32, i32, i32
  }
  func.func @transform_17(%arg0: i32) -> (i32, i32, i32) {
    %c0_i32 = arith.constant 0 : i32
    %c0_i32_0 = arith.constant 0 : i32
    %c0_i32_1 = arith.constant 0 : i32
    return %arg0, %c0_i32, %c0_i32_0 : i32, i32, i32
  }
  func.func @transform_18(%arg0: i32) -> (i32, i32, i32) {
    %c0_i32 = arith.constant 0 : i32
    %c0_i32_0 = arith.constant 0 : i32
    %c0_i32_1 = arith.constant 0 : i32
    return %arg0, %c0_i32, %c0_i32_0 : i32, i32, i32
  }
  func.func @transform_19(%arg0: i32) -> (i32, i32, i32) {
    %c0_i32 = arith.constant 0 : i32
    %c0_i32_0 = arith.constant 0 : i32
    %c0_i32_1 = arith.constant 0 : i32
    return %arg0, %c0_i32, %c0_i32_0 : i32, i32, i32
  }
  func.func @transform_20(%arg0: i32) -> (i32, i32) {
    %c0_i32 = arith.constant 0 : i32
    %c0_i32_0 = arith.constant 0 : i32
    %c0_i32_1 = arith.constant 0 : i32
    return %c0_i32, %c0_i32_0 : i32, i32
  }
  func.func @transform_21(%arg0: i32) -> (i32, i32) {
    %c0_i32 = arith.constant 0 : i32
    %c0_i32_0 = arith.constant 0 : i32
    %c0_i32_1 = arith.constant 0 : i32
    return %c0_i32, %c0_i32_0 : i32, i32
  }
  func.func @transform_22(%arg0: i32) -> (i32, i32, i32) {
    %c0_i32 = arith.constant 0 : i32
    %c0_i32_0 = arith.constant 0 : i32
    %c0_i32_1 = arith.constant 0 : i32
    %c0_i32_2 = arith.constant 0 : i32
    return %c0_i32, %c0_i32_0, %c0_i32_1 : i32, i32, i32
  }
  func.func @transform_23(%arg0: i32) -> (i32, i32) {
    %c0_i32 = arith.constant 0 : i32
    %c0_i32_0 = arith.constant 0 : i32
    %c0_i32_1 = arith.constant 0 : i32
    return %c0_i32, %c0_i32_0 : i32, i32
  }
}

</mosaic_0001>

<bundles_post_ra>
// kernel: tpu_custom_call.1
= control target key start
LH: loop header
LB: loop body
LE: loop exit
PB: predicated region body
PF: predicated region fallthrough
CT: control target
= control target key end

     0   :  { %s3796_s0 = inlined_call_operand.hbm [shape: f32[16,32], index: 0, kind: input, shape index: {}]   ;;  %s3797_s1 = inlined_call_operand.hbm [shape: f32[8,1,8], index: 1, kind: input, shape index: {}]   ;;  %s3798_s2 = inlined_call_operand.hbm [shape: f32[1,32], index: 2, kind: input, shape index: {}]   ;;  %s3799_s3 = inlined_call_operand.hbm [shape: f32[1,32], index: 3, kind: input, shape index: {}]   ;;  %s3800_s4 = inlined_call_operand.vmem [shape: f32[2,32,32], index: 4, kind: input, shape index: {}]   ;;  %s3801_s5 = inlined_call_operand.vmem [shape: f32[2,1,32], index: 5, kind: input, shape index: {}]   ;;  %s3802_s6 = inlined_call_operand.vmem [shape: f32[2,32,32], index: 6, kind: input, shape index: {}]   ;;  %s3803_s7 = inlined_call_operand.vmem [shape: f32[2,1,32], index: 7, kind: input, shape index: {}]   ;;  %s3804_s8 = inlined_call_operand.vmem [shape: f32[2,32,32], index: 8, kind: input, shape index: {}]   ;;  %s3805_s9 = inlined_call_operand.vmem [shape: f32[2,1,32], index: 9, kind: input, shape index: {}]   ;;  %s3806_s10 = inlined_call_operand.hbm [shape: f32[2,32,32], index: 10, kind: input, shape index: {}]   ;;  %s3807_s11 = inlined_call_operand.vmem [shape: f32[2,1,32], index: 11, kind: input, shape index: {}]   ;;  %s3808_s12 = inlined_call_operand.vmem [shape: f32[2,1,32], index: 12, kind: input, shape index: {}]   ;;  %s3809_s13 = inlined_call_operand.hbm [shape: f32[2,1,32], index: 13, kind: input, shape index: {}]   ;;  %s3810_s14 = inlined_call_operand.hbm [shape: f32[2,32,64], index: 14, kind: input, shape index: {}]   ;;  %s3811_s15 = inlined_call_operand.vmem [shape: f32[2,1,64], index: 15, kind: input, shape index: {}]   ;;  %s3812_s16 = inlined_call_operand.vmem [shape: f32[2,64,32], index: 16, kind: input, shape index: {}]   ;;  %s3813_s17 = inlined_call_operand.vmem [shape: f32[2,1,32], index: 17, kind: input, shape index: {}]   ;;  %s3814_s18 = inlined_call_operand.vmem [shape: f32[2,1,32], index: 18, kind: input, shape index: {}]   ;;  %s3815_s19 = inlined_call_operand.hbm [shape: f32[2,1,32], index: 19, kind: input, shape index: {}]   ;;  %s3816_s20 = inlined_call_operand.hbm [shape: f32[32,32], index: 20, kind: input, shape index: {}]   ;;  %s3817_s21 = inlined_call_operand.vmem [shape: f32[1,32], index: 21, kind: input, shape index: {}]   ;;  %s3818_s22 = inlined_call_operand.hbm [shape: f32[2,8,32], index: 22, kind: output, shape index: {0}]   ;;  %s3819_s23 = inlined_call_operand.hbm [shape: f32[2,32], index: 23, kind: output, shape index: {1}]  }
   0x1   :  { %3829 = sst [smem:[#allocation29_spill]] %s3796_s0 }
   0x2   :  { %3830 = sst [smem:[#allocation30_spill]] %s3797_s1 }
   0x3   :  { %3831 = sst [smem:[#allocation31_spill]] %s3798_s2 }
   0x4   :  { %3832 = sst [smem:[#allocation32_spill]] %s3799_s3 }
   0x5   :  { %3833 = sst [smem:[#allocation33_spill]] %s3800_s4 }
   0x6   :  { %3834 = sst [smem:[#allocation34_spill]] %s3801_s5 }
   0x7   :  { %3835 = sst [smem:[#allocation35_spill]] %s3802_s6 }
   0x8   :  { %3836 = sst [smem:[#allocation36_spill]] %s3803_s7 }
   0x9   :  { %3837 = sst [smem:[#allocation37_spill]] %s3804_s8 }
   0xa   :  { %3838 = sst [smem:[#allocation38_spill]] %s3805_s9 }
   0xb   :  { %3839 = sst [smem:[#allocation39_spill]] %s3806_s10 }
   0xc   :  { %3840 = sst [smem:[#allocation40_spill]] %s3807_s11 }
   0xd   :  { %3841 = sst [smem:[#allocation41_spill]] %s3808_s12 }
   0xe   :  { %3842 = sst [smem:[#allocation42_spill]] %s3809_s13 }
   0xf   :  { %3843 = sst [smem:[#allocation43_spill]] %s3810_s14 }
  0x10   :  { %3844 = sst [smem:[#allocation44_spill]] %s3811_s15 }
  0x11   :  { %3845 = sst [smem:[#allocation45_spill]] %s3812_s16 }
  0x12   :  { %3846 = sst [smem:[#allocation46_spill]] %s3813_s17 }
  0x13   :  { %3847 = sst [smem:[#allocation47_spill]] %s3814_s18 }
  0x14   :  { %3848 = sst [smem:[#allocation48_spill]] %s3815_s19 }
  0x15   :  { %3849 = sst [smem:[#allocation49_spill]] %s3816_s20 }
  0x16   :  { %3850 = sst [smem:[#allocation50_spill]] %s3817_s21 }
  0x17   :  { %3851 = sst [smem:[#allocation51_spill]] %s3818_s22 }
  0x18   :  { %3852 = sst [smem:[#allocation52_spill]] %s3819_s23 }
  0x19   :  { %29 = vsyncpa [#allocation4], 0 }
  0x1a   :  { %30 = vsyncpa [#allocation7], 0 }
  0x1b   :  { %31 = vsyncpa [#allocation10], 0 }
  0x1c   :  { %32 = vsyncpa [#allocation5], 0 }
  0x1d   :  { %33 = vsyncpa [#allocation18], 0  ;;  %s3282_s4 = smov 0   ;;  %s3284_s30 = smov 0  }
  0x1e   :  { %s3286_s24 = smov 0   ;;  %s3288_s25 = smov 0  }
  0x1f LB: > { %3853 = sst [smem:[#allocation26_spill]] %s3136_s24  ;;  %s3301_s5 = sadd.s32 4294967295, %s3140_s25   ;;  %s3140_s25 = sphi %s3288_s25, %s3901_s25   ;;  %s3136_s24 = sphi %s3286_s24, %s3903_s24   ;;  %s3132_s30 = sphi %s3284_s30, %s3905_s30   ;;  %s3128_s4 = sphi %s3282_s4, %s3904_s4  }
  0x20   : > { %p299_p0 = scmp.ne.s32.totalorder %s3132_s30, %s3128_s4  ;;  %p300_p1 = scmp.eq.s32.totalorder %s3301_s5, 0 }
  0x21   : > { %p2464_p2 = scmp.ge.s32.totalorder %s3140_s25, 1  ;;  %p628_p3 = scmp.lt.s32.totalorder %s3140_s25, 3 }
  0x22   : > { %p2465_p4 = scmp.ne.s32.totalorder %s3301_s5, 0  ;;  %p3310_p5 = por %p300_p1, %p299_p0 }
  0x23   : > { %s3855_s6 = sld [smem:[#allocation29_spill]]  ;;  %p3317_p6 = pnand %p2464_p2, %p628_p3 }
  0x24   : > { %s3142_s28 = smov [#allocation3]   ;;  %s3330_s0 = sadd.s32 1, %s3140_s25  }
  0x25   : > { %p2580_p7 = pneg %p3317_p6  ;;  %s641_s29 = sshll.u32 %s3142_s28, 4  ;;  %s642_s29 = int_to_ptr.vmem [resolvable:$true] %s641_s29 }
  0x26   : > { %3858 = sst [smem:[#allocation27_spill]] %s3330_s0  ;;  %s3820_s4 = smov 128  }
  0x27   : > { %p3325_p8 = pnand %p2580_p7, %p300_p1  ;;  %s3822_s26 = smov 8  }
  0x28   : > { %s283_s2 = ssub.s32 %s3140_s25, %s3330_s0  ;;  %p293_p10 = scmp.ne.s32.totalorder %s3136_s24, %s3132_s30 }
  0x29   : > { %s639_s27 = sshll.u32 %s3855_s6, 4  ;;  %s286_s6 = sadd.s32 1, %s3136_s24  ;;  %s640_s27 = int_to_ptr.hbm [resolvable:$true] %s639_s27 }
  0x2a   : > { %2583 = dma.hbm_to_vmem [thread:$0]  (!%p3325_p8), %s640_s27, 256, %s642_s29, [#allocation4], %s3820_s4, %s3820_s4, %s3822_s26  }
  0x2b   : > { %p284_p9 = scmp.eq.s32.totalorder %s283_s2, 0  ;;  %p294_p11 = scmp.eq.s32.totalorder %s3140_s25, 0 }
  0x2c   : > { %p2614_p12 = scmp.lt.s32.totalorder %s3140_s25, 2  ;;  %s752_s23 = sand.u32 1, %s3140_s25  }
  0x2d   : > { %s3345_s28 = scalar_select %p284_p9, %s3136_s24, %s286_s6  }
  0x2e   : > { %p295_p13 = por %p294_p11, %p293_p10  ;;  %s3349_s22 = sand.u32 1, %s3136_s24  }
  0x2f   : > { %3859 = sst [smem:[#allocation28_spill]] %s3345_s28  ;;  %s3827_s21 = sshll.u32 %s3349_s22, 5 }
  0x30   : > { %s3828_s18 = sshll.u32 %s3140_s25, 5  ;;  %s3860_s10 = sld [smem:[#allocation39_spill]] }
  0x31   : > { %s756_s4 = scalar_lea.vmem [#allocation11], %s3827_s21  ;;  %p3362_p0 = pnand %p2614_p12, %p295_p13 }
  0x32   : > { %s764_s26 = sshll.u32 %s756_s4, 4  ;;  %s3862_s0 = sld [smem:[#allocation30_spill]]  ;;  %s765_s26 = int_to_ptr.vmem [resolvable:$true] %s764_s26 }
  0x33   : > { %s3145_s16 = smov [#allocation6]   ;;  %p2790_p3 = pneg %p3362_p0 }
  0x34   : > { %s655_s27 = sshll.u32 %s3145_s16, 4  ;;  %s656_s27 = int_to_ptr.vmem [resolvable:$true] %s655_s27 }
  0x36   : > { %s761_s29 = scalar_lea.hbm %s3860_s10, %s3828_s18  ;;  %s2793_s28 = scalar_lea.hbm %s3860_s10, 64 }
  0x37   : > { %s762_s2 = sshll.u32 %s761_s29, 4  ;;  %s3369_s29 = scalar_lea.sflag [#allocation4], %s752_s23  ;;  %s763_s2 = int_to_ptr.hbm [resolvable:$true] %s762_s2 }
  0x38   : > { %s653_s17 = sshll.u32 %s3862_s0, 4  ;;  %s2786_s21 = sshra.s32 %s763_s2, 4  ;;  %s654_s17 = int_to_ptr.hbm [resolvable:$true] %s653_s17  ;;  %s2787_s21 = int_to_ptr.hbm [resolvable:$true] %s2786_s21 }
  0x39   : > { %s2788_s4 = scalar_lea.hbm %s2787_s21, 32  ;;  %p2794_p10 = scmp.lt.s32.totalorder %s2787_s21, %s3860_s10 }
  0x3a   : > { %p2789_p2 = scmp.ne.s32.totalorder %s2787_s21, %s2788_s4  ;;  %p2795_p11 = scmp.lt.s32.totalorder %s2793_s28, %s2788_s4 }
  0x3c   : > { %p2791_p7 = pnand %p2790_p3, %p2789_p2  ;;  %p2796_p12 = por %p2795_p11, %p2794_p10 }
  0x3e   : > { %p2792_p9 = pneg %p2791_p7 }
  0x40   : > { %p2797_p13 = pnand %p2796_p12, %p2792_p9 }
  0x42   : > { %2800 = shalt.err (!%p2797_p13)
}
  0x43   : > { %s3863_s23 = smov 8   ;;  %s3864_s16 = smov 128  }
  0x44   : > { %2599 = dma.hbm_to_vmem [thread:$0]  (!%p3362_p0), %s763_s2, 512, %s765_s26, %s3369_s29, %s3864_s16, %s3864_s16, %s3863_s23  }
  0x45   : > { %s3146_s18 = smov 16   ;;  %s3147_s24 = smov 1  }
  0x46   : > { %2586 = dma.hbm_to_vmem [thread:$0]  (!%p3325_p8), %s654_s17, 128, %s656_s27, [#allocation7], %s3146_s18, %s3146_s18, %s3147_s24  }
  0x47   : > { %s3865_s13 = sld [smem:[#allocation42_spill]]  ;;  %s789_s28 = scalar_lea.vmem [#allocation12], %s3349_s22 }
  0x48   : > { %s796_s0 = sshll.u32 %s789_s28, 4  ;;  %s3866_s9 = sld [smem:[#allocation31_spill]]  ;;  %s797_s0 = int_to_ptr.vmem [resolvable:$true] %s796_s0 }
  0x4d   : > { %s792_s4 = scalar_lea.hbm %s3865_s13, %s3140_s25  ;;  %s2853_s18 = scalar_lea.hbm %s3865_s13, 2 }
  0x4e   : > { %s794_s10 = sshll.u32 %s792_s4, 4  ;;  %s668_s8 = sshll.u32 %s3866_s9, 4  ;;  %s795_s10 = int_to_ptr.hbm [resolvable:$true] %s794_s10  ;;  %s669_s8 = int_to_ptr.hbm [resolvable:$true] %s668_s8 }
  0x4f   : > { %s2846_s26 = sshra.s32 %s795_s10, 4  ;;  %s2847_s26 = int_to_ptr.hbm [resolvable:$true] %s2846_s26 }
  0x50   : > { %s2848_s2 = scalar_lea.hbm %s2847_s26, 1  ;;  %p2854_p10 = scmp.lt.s32.totalorder %s2847_s26, %s3865_s13 }
  0x51   : > { %p2849_p2 = scmp.ne.s32.totalorder %s2847_s26, %s2848_s2  ;;  %p2855_p11 = scmp.lt.s32.totalorder %s2853_s18, %s2848_s2 }
  0x53   : > { %p2851_p7 = pnand %p2849_p2, %p2790_p3  ;;  %p2856_p12 = por %p2855_p11, %p2854_p10 }
  0x55   : > { %p2852_p9 = pneg %p2851_p7 }
  0x57   : > { %p2857_p13 = pnand %p2856_p12, %p2852_p9 }
  0x59   : > { %2860 = shalt.err (!%p2857_p13)
}
  0x5a   : > { %2602 = dma.hbm_to_vmem [thread:$0]  (!%p3362_p0), %s795_s10, 16, %s797_s0, %s3369_s29  }
  0x5b   : > { %s3148_s9 = smov [#allocation8]   ;;  %s3867_s12 = sshll.u32 %s3140_s25, 5 }
  0x5c   : > { %s670_s11 = sshll.u32 %s3148_s9, 4  ;;  %s3868_s14 = sld [smem:[#allocation43_spill]]  ;;  %s671_s11 = int_to_ptr.vmem [resolvable:$true] %s670_s11 }
  0x5d   : > { %2589 = dma.hbm_to_vmem [thread:$0]  (!%p3325_p8), %s669_s8, 16, %s671_s11, [#allocation7]  }
  0x5e   : > { %s3869_s2 = sshll.u32 %s3349_s22, 5 }
  0x5f   : > { %s807_s17 = scalar_lea.vmem [#allocation13], %s3869_s2 }
  0x60   : > { %s815_s27 = sshll.u32 %s807_s17, 4  ;;  %s816_s27 = int_to_ptr.vmem [resolvable:$true] %s815_s27 }
  0x62   : > { %s812_s28 = scalar_lea.hbm %s3868_s14, %s3867_s12  ;;  %s2913_s15 = scalar_lea.hbm %s3868_s14, 64 }
  0x63   : > { %s813_s26 = sshll.u32 %s812_s28, 4  ;;  %s814_s26 = int_to_ptr.hbm [resolvable:$true] %s813_s26 }
  0x64   : > { %s2906_s18 = sshra.s32 %s814_s26, 4  ;;  %s2907_s18 = int_to_ptr.hbm [resolvable:$true] %s2906_s18 }
  0x65   : > { %s2908_s10 = scalar_lea.hbm %s2907_s18, 32  ;;  %p2914_p10 = scmp.lt.s32.totalorder %s2907_s18, %s3868_s14 }
  0x66   : > { %p2909_p2 = scmp.ne.s32.totalorder %s2907_s18, %s2908_s10  ;;  %p2915_p11 = scmp.lt.s32.totalorder %s2913_s15, %s2908_s10 }
  0x68   : > { %p2911_p7 = pnand %p2909_p2, %p2790_p3  ;;  %p2916_p12 = por %p2915_p11, %p2914_p10 }
  0x6a   : > { %p2912_p9 = pneg %p2911_p7 }
  0x6c   : > { %p2917_p13 = pnand %p2916_p12, %p2912_p9 }
  0x6e   : > { %2920 = shalt.err (!%p2917_p13)
}
  0x6f   : > { %2605 = dma.hbm_to_vmem [thread:$0]  (!%p3362_p0), %s814_s26, 512, %s816_s27, %s3369_s29, %s3864_s16, %s3864_s16, %s3863_s23  }
  0x70   : > { %s3870_s21 = sld [smem:[#allocation32_spill]]  ;;  %s3149_s28 = smov [#allocation9]  }
  0x71   : > { %s682_s2 = sshll.u32 %s3149_s28, 4  ;;  %s3871_s20 = sld [smem:[#allocation49_spill]]  ;;  %s683_s2 = int_to_ptr.vmem [resolvable:$true] %s682_s2 }
  0x72   : > { %s3150_s0 = smov [#allocation15]   ;;  %s3872_s19 = sld [smem:[#allocation48_spill]] }
  0x73   : > { %s693_s24 = sshll.u32 %s3150_s0, 4  ;;  %s854_s8 = scalar_lea.vmem [#allocation14], %s3349_s22  ;;  %s694_s24 = int_to_ptr.vmem [resolvable:$true] %s693_s24 }
  0x74   : > { %s861_s11 = sshll.u32 %s854_s8, 4  ;;  %s862_s11 = int_to_ptr.vmem [resolvable:$true] %s861_s11 }
  0x76   : > { %s680_s4 = sshll.u32 %s3870_s21, 4  ;;  %s681_s4 = int_to_ptr.hbm [resolvable:$true] %s680_s4 }
  0x77   : > { %s691_s10 = sshll.u32 %s3871_s20, 4  ;;  %s692_s10 = int_to_ptr.hbm [resolvable:$true] %s691_s10 }
  0x78   : > { %2592 = dma.hbm_to_vmem [thread:$0]  (!%p3325_p8), %s681_s4, 16, %s683_s2, [#allocation10]  }
  0x79   : > { %s857_s15 = scalar_lea.hbm %s3872_s19, %s3140_s25  ;;  %s3003_s3 = scalar_lea.hbm %s3872_s19, 2 }
  0x7a   : > { %2595 = dma.hbm_to_vmem [thread:$0]  (!%p3325_p8), %s692_s10, 512, %s694_s24, [#allocation7], %s3864_s16, %s3864_s16, %s3863_s23  }
  0x7b   : > { %s859_s9 = sshll.u32 %s857_s15, 4  ;;  %s860_s9 = int_to_ptr.hbm [resolvable:$true] %s859_s9 }
  0x7c   : > { %s2996_s12 = sshra.s32 %s860_s9, 4  ;;  %s2997_s12 = int_to_ptr.hbm [resolvable:$true] %s2996_s12 }
  0x7d   : > { %s2998_s21 = scalar_lea.hbm %s2997_s12, 1  ;;  %p3004_p8 = scmp.lt.s32.totalorder %s2997_s12, %s3872_s19 }
  0x7e   : > { %p2999_p2 = scmp.ne.s32.totalorder %s2997_s12, %s2998_s21  ;;  %p3005_p10 = scmp.lt.s32.totalorder %s3003_s3, %s2998_s21 }
  0x80   : > { %p3001_p7 = pnand %p2999_p2, %p2790_p3  ;;  %p3006_p11 = por %p3005_p10, %p3004_p8 }
  0x82   : > { %p3002_p9 = pneg %p3001_p7 }
  0x84   : > { %p3007_p12 = pnand %p3006_p11, %p3002_p9 }
  0x86   : > { %3010 = shalt.err (!%p3007_p12)
}
  0x87   : > { %2608 = dma.hbm_to_vmem [thread:$0]  (!%p3362_p0), %s860_s9, 16, %s862_s11, %s3369_s29  }
  0x88   : > { %870 = sbr.rel (%p3317_p6) target bundleno = 2530 (0x9e2), region = 108 }
  0x8d   : > { %3099 = dma.done.wait (%p300_p1), [#allocation4], 256  }
  0x8e   : > { %3101 = vsyncadd (%p300_p1), [#allocation4], 4294967040 }
  0x8f   : > { %3103 = dma.done.wait (%p300_p1), [#allocation7], 144  }
  0x90   : > { %3105 = vsyncadd (%p300_p1), [#allocation7], 4294967152 }
  0x91   : > { %3107 = dma.done.wait (%p300_p1), [#allocation10], 16  }
  0x92   : > { %3109 = vsyncadd (%p300_p1), [#allocation10], 4294967280  ;;  %s892_s22 = sand.u32 1, %s3301_s5   ;;  %s3480_s7 = sand.u32 1, %s3132_s30  }
  0x93   : > { %s2482_s6 = sshll.u32 %s3480_s7, 5  ;;  %s893_s29 = scalar_lea.sflag [#allocation4], %s892_s22 }
  0x94   : > { %s3483_s23 = scalar_lea.vmem [#allocation11], %s2482_s6 }
  0x95   : > { %3111 = dma.done.wait (%p3310_p5), %s893_s29, 1056  }
  0x96   : > { %3113 = vsyncadd (%p3310_p5), %s893_s29, 4294966240  ;;  %s3490_s17 = scalar_lea.vmem [#allocation13], %s2482_s6 }
  0x97   : > { %3115 = dma.done.wait (%p300_p1), [#allocation7], 512  }
  0x98   : > { %3117 = vsyncadd (%p300_p1), [#allocation7], 4294966784  ;;  %p1045_p6 = scmp.lt.s32.totalorder %s3301_s5, 1  ;;  %s3874_s8 = sld [smem:[#allocation33_spill]] }
  0x99   : > { %s3875_s4 = sld [smem:[#allocation35_spill]] }
  0x9a   : > { %s3499_s10 = scalar_select %p1045_p6, %s3301_s5, 1 }
  0x9b   : > { %s3877_s18 = sld [smem:[#allocation37_spill]] }
  0x9c   : > { %s2540_s1 = sshll.u32 %s3499_s10, 5  ;;  %s3878_s26 = sld [smem:[#allocation38_spill]] }
  0x9d   : > { %s3881_s28 = sld [smem:[#allocation44_spill]]  ;;  %s2543_s22 = sshll.u32 %s3499_s10, 6 }
  0x9e   : > { %s3509_s11 = scalar_lea.vmem %s3874_s8, %s2540_s1  ;;  %s3883_s24 = sld [smem:[#allocation45_spill]] }
  0x9f   : > { %s3514_s25 = scalar_lea.vmem %s3875_s4, %s2540_s1  ;;  %s3880_s4 = sld [smem:[#allocation41_spill]] }
  0xa0   : > { %s3884_s8 = sld [smem:[#allocation47_spill]] }
  0xa1   : > { %s3523_s16 = scalar_lea.vmem %s3877_s18, %s2540_s1  ;;  %s3882_s1 = sld [smem:[#allocation46_spill]] }
  0xa2   : > { %s1068_s15 = scalar_lea.vmem %s3878_s26, %s3499_s10 }
  0xa3   : > { %s1077_s2 = scalar_lea.vmem %s3881_s28, %s3499_s10  ;;  %1092 = sbr.rel (%p2465_p4) target bundleno = 446 (0x1be), region = 148 }
  0xa4   : > { %s3549_s26 = scalar_lea.vmem %s3883_s24, %s2543_s22 }
  0xa5   : > { %s1074_s14 = scalar_lea.vmem %s3880_s4, %s3499_s10 }
  0xa6   : > { %s1088_s13 = scalar_lea.vmem %s3884_s8, %s3499_s10 }
  0xa7   : > { %s1085_s29 = scalar_lea.vmem %s3882_s1, %s3499_s10 }
  0xa8   : > { %v1093_v0 = vld [vmem:[#allocation3] sm:$0xff]  ;;  %vm1097_vm0 = vcmask 261120   ;;  %v1094_v2 = vld [vmem:[#allocation3 + $0x8] sm:$0xff]  ;;  %v3151_v4 = vmov 32.0   ;;  %v2676_v35 = vld [vmem:[#allocation8] ss:$0 sm:$0xff] }
  0xa9   : > { %v1098_v1 = vsel %vm1097_vm0, %v1093_v0, 0.0  ;;  %v1101_v3 = vsel %vm1097_vm0, %v1094_v2, 0.0  ;;  %2678 = vrcp.f32 %v3151_v4  ;;  %v2677_v38 = vld [vmem:[#allocation9] ss:$0 sm:$0xff] }
  0xaa   : > { %1099 = vadd.xlane.f32.xlu0 %v1098_v1 }
  0xaf   : > { %v2679_v5 = vpop.eup %2678 }
  0xb0   : > { %v1105_v6 = vmul.f32 32.0, %v2679_v5  ;;  %vm1109_vm1 = vweird.f32 %v2679_v5 }
  0xb2   : > { %1102 = vadd.xlane.f32.xlu0 %v1101_v3  ;;  %v1106_v7 = vsub.f32 1.0, %v1105_v6 }
  0xb4   : > { %v1107_v8 = vmul.f32 %v2679_v5, %v1106_v7 }
  0xb6   : > { %v1108_v9 = vadd.f32 %v2679_v5, %v1107_v8 }
  0xb8   : > { %v1110_v10 = vsel %vm1109_vm1, %v2679_v5, %v1108_v9 }
 0x11d   : > { %v1100_v11 = vpop.xlane.xlu0 %1099 }
 0x11e   : > { %v1111_v12 = vmul.f32 %v1110_v10, %v1100_v11 }
 0x120   : > { %v1113_v13 = vsub.f32 %v1093_v0, %v1111_v12 }
 0x122   : > { %v1115_v14 = vmul.f32 %v1113_v13, %v1113_v13 }
 0x124   : > { %v1117_v15 = vsel %vm1097_vm0, %v1115_v14, 0.0 }
 0x125   : > { %1118 = vadd.xlane.f32.xlu1 %v1117_v15  ;;  %v1103_v16 = vpop.xlane.xlu0 %1102 }
 0x126   : > { %v1112_v17 = vmul.f32 %v1110_v10, %v1103_v16 }
 0x128   : > { %v1114_v18 = vsub.f32 %v1094_v2, %v1112_v17 }
 0x12a   : > { %v1116_v19 = vmul.f32 %v1114_v18, %v1114_v18 }
 0x12c   : > { %v1120_v20 = vsel %vm1097_vm0, %v1116_v19, 0.0 }
 0x12d   : > { %1121 = vadd.xlane.f32.xlu1 %v1120_v20 }
 0x198   : > { %v1119_v21 = vpop.xlane.xlu1 %1118 }
 0x199   : > { %v1123_v22 = vmul.f32 %v1119_v21, %v1110_v10 }
 0x19b   : > { %v1125_v23 = vadd.f32 1e-12, %v1123_v22 }
 0x19d   : > { %2680 = vrsqrt.f32 %v1125_v23  ;;  %vm1133_vm3 = vweird.f32 %v1125_v23 }
 0x1a0   : > { %v1122_v24 = vpop.xlane.xlu1 %1121 }
 0x1a1   : > { %v1124_v25 = vmul.f32 %v1122_v24, %v1110_v10 }
 0x1a3   : > { %v2681_v26 = vpop.eup %2680  ;;  %v1126_v27 = vadd.f32 1e-12, %v1124_v25 }
 0x1a4   : > { %v1128_v28 = vmul.f32 %v2681_v26, %v1125_v23  ;;  %vm1134_vm2 = vweird.f32 %v2681_v26 }
 0x1a5   : > { %2682 = vrsqrt.f32 %v1126_v27  ;;  %vm1135_vm4 = vmor %vm1133_vm3, %vm1134_vm2  ;;  %vm1143_vm6 = vweird.f32 %v1126_v27 }
 0x1a6   : > { %v1129_v29 = vmul.f32 %v2681_v26, %v1128_v28 }
 0x1a8   : > { %v1130_v30 = vmul.f32 0.5, %v1129_v29 }
 0x1aa   : > { %v1131_v31 = vsub.f32 1.5, %v1130_v30 }
 0x1ab   : > { %v2683_v32 = vpop.eup %2682 }
 0x1ac   : > { %v1132_v33 = vmul.f32 %v2681_v26, %v1131_v31  ;;  %v1138_v34 = vmul.f32 %v2683_v32, %v1126_v27  ;;  %vm1144_vm5 = vweird.f32 %v2683_v32 }
 0x1ad   : > { %vm1145_vm7 = vmor %vm1143_vm6, %vm1144_vm5 }
 0x1ae   : > { %v1136_v36 = vsel %vm1135_vm4, %v2681_v26, %v1132_v33  ;;  %v1139_v37 = vmul.f32 %v2683_v32, %v1138_v34 }
 0x1af   : > { %v1147_v39 = vmul.f32 %v1136_v36, %v1113_v13 }
 0x1b0   : > { %v1140_v40 = vmul.f32 0.5, %v1139_v37 }
 0x1b1   : > { %v1152_v41 = vmul.f32 %v2676_v35, %v1147_v39 }
 0x1b2   : > { %v1141_v42 = vsub.f32 1.5, %v1140_v40 }
 0x1b3   : > { %v1157_v43 = vadd.f32 %v2677_v38, %v1152_v41 }
 0x1b4   : > { %v1142_v44 = vmul.f32 %v2683_v32, %v1141_v42 }
 0x1b5   : > { %1159 = vst.msk [vmem:[#allocation2] sm:$0xff] %vm1097_vm0, %v1157_v43 }
 0x1b6   : > { %v1146_v45 = vsel %vm1145_vm7, %v2683_v32, %v1142_v44 }
 0x1b7   : > { %v1148_v46 = vmul.f32 %v1146_v45, %v1114_v18 }
 0x1b9   : > { %v1153_v47 = vmul.f32 %v2676_v35, %v1148_v46 }
 0x1bb   : > { %v1158_v48 = vadd.f32 %v2677_v38, %v1153_v47 }
 0x1bd   : > { %1160 = vst.msk [vmem:[#allocation2 + $0x8] sm:$0xff] %vm1097_vm0, %v1158_v48 }
 0x1be PF: > { %v1204_v49 = vld [vmem:[%s3514_s25 + $0x18] sm:$0xff]  ;;  %v1203_v50 = vld [vmem:[%s3514_s25 + $0x10] sm:$0xff]  ;;  %v1202_v53 = vld [vmem:[%s3514_s25 + $0x8] sm:$0xff]  ;;  %vm1171_vm8 = vcmask 261120   ;;  %s3887_s21 = sld [smem:[#allocation34_spill]]  ;;  %vm1311_vm9 = vcmask 64512  }
 0x1bf   : > { %v1166_v51 = vld [vmem:[%s3509_s11 + $0x18] sm:$0xff]  ;;  %1221 = vmatpush.msra.mxu1 %v1204_v49  ;;  %v1165_v52 = vld [vmem:[%s3509_s11 + $0x10] sm:$0xff]  ;;  %v1201_v54 = vld [vmem:[%s3514_s25] sm:$0xff]  ;;  %s3152_s3 = smov 104   ;;  %s3153_s28 = smov 120   ;;  %vm1850_vm10 = vcmask 130048  }
 0x1c0   : > { %1190 = vmatpush.msra.mxu0 %v1166_v51  ;;  %v1164_v55 = vld [vmem:[%s3509_s11 + $0x8] sm:$0xff]  ;;  %v3570_v56 = vld [vmem:[#allocation2] sm:$0xff]  ;;  %s3154_s6 = smov 112   ;;  %v1235_v5 = vld [vmem:[%s3523_s16 + $0x18] sm:$0xff]  ;;  %s3156_s0 = smov 8   ;;  %vm1853_vm11 = vcmask 195584  }
 0x1c1   : > { %1222 = vmatpush.msra.mxu1 %v1203_v50  ;;  %v1163_v57 = vld [vmem:[%s3509_s11] sm:$0xff]  ;;  %s3885_s11 = sld [smem:[#allocation36_spill]]  ;;  %1252 = vmatpush.msra.mxu2 %v1235_v5  ;;  %v1234_v6 = vld [vmem:[%s3523_s16 + $0x10] sm:$0xff]  ;;  %v1233_v7 = vld [vmem:[%s3523_s16 + $0x8] sm:$0xff]  ;;  %s3157_s24 = smov 24   ;;  %vm2025_vm3 = vcmask 523264  }
 0x1c2   : > { %1191 = vmatpush.msra.mxu0 %v1165_v52  ;;  %v1232_v8 = vld [vmem:[%s3523_s16] sm:$0xff]  ;;  %s3890_s27 = sld [smem:[#allocation40_spill]]  ;;  %p2530_p1 = scmp.ne.s32.totalorder %s3301_s5, 1 }
 0x1c3   : > { %1223 = vmatpush.msra.mxu1 %v1202_v53  ;;  %1253 = vmatpush.msra.mxu2 %v1234_v6  ;;  %v2691_v15 = vld [vmem:[#allocation6] ss:$0 sm:$0xff]  ;;  %v2692_v25 = vld [vmem:[#allocation6 + $0x1] ss:$0 sm:$0xff]  ;;  %v2694_v40 = vld [vmem:[#allocation6 + $0x4] ss:$0 sm:$0xff] }
 0x1c4   : > { %1192 = vmatpush.msra.mxu0 %v1164_v55  ;;  %v3577_v58 = vld [vmem:[#allocation2 + $0x8] sm:$0xff]  ;;  %s3888_s4 = scalar_lea.vmem %s3887_s21, %s3499_s10  ;;  %v2693_v32 = vld [vmem:[%s1068_s15] ss:$0 sm:$0xff]  ;;  %v2695_v45 = vld [vmem:[#allocation6 + $0x6] ss:$0 sm:$0xff]  ;;  %s3155_s15 = smov 16  }
 0x1c5   : > { %1224 = vmatpush.msra.mxu1 %v1201_v54  ;;  %v2690_v60 = vld [vmem:[%s3888_s4] ss:$0 sm:$0xff]  ;;  %1254 = vmatpush.msra.mxu2 %v1233_v7  ;;  %v2696_v49 = vld [vmem:[#allocation6 + $0x3] ss:$0 sm:$0xff]  ;;  %v2697_v53 = vld [vmem:[#allocation6 + $0x2] ss:$0 sm:$0xff] }
 0x1c6   : > { %1193 = vmatpush.msra.mxu0 %v1163_v57  ;;  %2496 = vmatmul.msk.f32.vlgmr.msra.gmra.mxu1 %vm1171_vm8, %v3570_v56 }
 0x1c7   : > { %2494 = vmatmul.msk.f32.vlgmr.msra.gmra.mxu0 %vm1171_vm8, %v3570_v56  ;;  %s3886_s25 = scalar_lea.vmem %s3885_s11, %s3499_s10  ;;  %1255 = vmatpush.msra.mxu2 %v1232_v8 }
 0x1c8   : > { %v2689_v59 = vld [vmem:[%s3886_s25] ss:$0 sm:$0xff]  ;;  %2498 = vmatmul.msk.f32.vlgmr.msra.gmra.mxu2 %vm1171_vm8, %v3570_v56  ;;  %s3891_s8 = scalar_lea.vmem %s3890_s27, %s3499_s10  ;;  %s3898_s10 = sld [smem:[#allocation50_spill]] (!%p2530_p1) }
 0x1ce   : > { %2497 = vmatmul.msk.f32.gmra.mxu1 %vm1171_vm8, %v3577_v58 }
 0x1cf   : > { %2495 = vmatmul.msk.f32.gmra.mxu0 %vm1171_vm8, %v3577_v58 }
 0x1d0   : > { %2499 = vmatmul.msk.f32.gmra.mxu2 %vm1171_vm8, %v3577_v58 }
 0x243   : > { %v1226_v61 = vpop.f32.mrf.mxu1 }
 0x244   : > { %v1195_v62 = vpop.f32.mrf.mxu0  ;;  %v1227_v63 = vadd.f32 %v2689_v59, %v1226_v61 }
 0x245   : > { %v1196_v0 = vadd.f32 %v2690_v60, %v1195_v62 }
 0x246   : > { %1287 = vrot.lane.b32.xlu1 %v1227_v63, %s3152_s3  ;;  %1279 = vrot.lane.b32.xlu0 %v1227_v63, %s3153_s28 }
 0x247   : > { %2500 = vmatpush.xpose.msk.msrb.mxu0 %vm1311_vm9, %v1227_v63 }
 0x24a   : > { %2501 = vmatmul.msk.f32.vlgmr.msrb.gmra.mxu0 %vm1311_vm9, %v1196_v0 }
 0x24b   : > { %v1229_v1 = vpop.f32.mrf.mxu1  ;;  %v1257_v31 = vpop.f32.mrf.mxu2 }
 0x24c   : > { %v1198_v2 = vpop.f32.mrf.mxu0  ;;  %v1230_v3 = vadd.f32 %v2689_v59, %v1229_v1  ;;  %v1258_v33 = vadd.f32 %v2693_v32, %v1257_v31 }
 0x24d   : > { %v1199_v4 = vadd.f32 %v2690_v60, %v1198_v2 }
 0x24e   : > { %1285 = vrot.lane.b32.xlu2 %v1230_v3, %s3154_s6  ;;  %2502 = vmatpush.xpose.msk.msra.mxu3 %vm1311_vm9, %v1230_v3 }
 0x24f   : > { %1273 = vrot.lane.b32.xlu1 %v1196_v0, %s3152_s3  ;;  %1265 = vrot.lane.b32.xlu0 %v1196_v0, %s3153_s28 }
 0x251   : > { %2503 = vmatmul.msk.f32.vlgmr.msra.gmra.mxu3 %vm1311_vm9, %v1199_v4 }
 0x253   : > { %v1260_v34 = vpop.f32.mrf.mxu2 }
 0x254   : > { %v3636_v35 = vadd.f32 %v2693_v32, %v1260_v34 }
 0x256   : > { %1271 = vrot.lane.b32.xlu2 %v1199_v4, %s3154_s6 }
 0x257   : > { %1283 = vrot.lane.b32.xlu0 %v1227_v63, %s3154_s6  ;;  %1281 = vrot.lane.b32.xlu1 %v1230_v3, %s3153_s28 }
 0x25e   : > { %1269 = vrot.lane.b32.xlu2 %v1196_v0, %s3154_s6  ;;  %v2698_v0 = vld [vmem:[#allocation6 + $0x5] ss:$0 sm:$0xff] }
 0x25f   : > { %1267 = vrot.lane.b32.xlu0 %v1199_v4, %s3153_s28  ;;  %1289 = vrot.lane.b32.xlu1 %v1230_v3, %s3152_s3 }
 0x266   : > { %1275 = vrot.lane.b32.xlu2 %v1199_v4, %s3152_s3  ;;  %v2684_v4 = vpack.i.bf16 %v3636_v35, %v1258_v33 }
 0x2a8   : > { %v1286_v9 = vpop.permute.xlu2 %1285 }
 0x2a9   : > { %2510 = vmatpush.xpose.msk.msrb.mxu2 %vm1311_vm9, %v1286_v9  ;;  %v2699_v9 = vld [vmem:[#allocation6 + $0x7] ss:$0 sm:$0xff] }
 0x2ad   : > { %1681 = vmatpush.msra.mxu2 %v3636_v35 }
 0x2b0   : > { %v1272_v10 = vpop.permute.xlu2 %1271 }
 0x2b1   : > { %2511 = vmatmul.msk.f32.vlgmr.msrb.gmra.mxu2 %vm1311_vm9, %v1272_v10 }
 0x2b8   : > { %v1288_v11 = vpop.permute.xlu1 %1287  ;;  %v1280_v12 = vpop.permute.xlu0 %1279 }
 0x2b9   : > { %2504 = vmatpush.xpose.msk.msrb.mxu3 %vm1311_vm9, %v1280_v12  ;;  %v1270_v21 = vpop.permute.xlu2 %1269 }
 0x2bd   : > { %2512 = vmatpush.xpose.msk.msra.mxu3 %vm1311_vm9, %v1288_v11 }
 0x2c1   : > { %v1274_v13 = vpop.permute.xlu1 %1273  ;;  %v1266_v14 = vpop.permute.xlu0 %1265 }
 0x2c2   : > { %2505 = vmatmul.msk.f32.vlgmr.msrb.gmra.mxu3 %vm1311_vm9, %v1266_v14  ;;  %v1276_v29 = vpop.permute.xlu2 %1275 }
 0x2c7   : > { %v1333_v16 = vpop.f32.mrf.mxu0 }
 0x2c8   : > { %v1504_v17 = vmul.f32 0.35355338, %v1333_v16 }
 0x2c9   : > { %v1284_v18 = vpop.permute.xlu0 %1283  ;;  %v1282_v19 = vpop.permute.xlu1 %1281 }
 0x2ca   : > { %2508 = vmatpush.xpose.msk.msrb.mxu1 %vm1311_vm9, %v1284_v18  ;;  %2513 = vmatmul.msk.f32.vlgmr.msra.gmra.mxu3 %vm1311_vm9, %v1274_v13  ;;  %v1544_v20 = vadd.f32 %v2691_v15, %v1504_v17 }
 0x2cb   : > { %2506 = vmatpush.xpose.msk.msra.mxu0 %vm1311_vm9, %v1282_v19 }
 0x2cc   : > { %v1552_v22 = vsel %vm1311_vm9, %v1544_v20, -inf }
 0x2cd   : > { %2509 = vmatmul.msk.f32.vlgmr.msrb.gmra.mxu1 %vm1311_vm9, %v1270_v21  ;;  %1553 = vmax.xlane.f32.xlu1 %v1552_v22 }
 0x2ce   : > { %1658 = vmatpush.msra.mxu1 %v1258_v33 }
 0x2d1   : > { %v1268_v23 = vpop.permute.xlu0 %1267  ;;  %v1290_v24 = vpop.permute.xlu1 %1289 }
 0x2d2   : > { %2507 = vmatmul.msk.f32.vlgmr.msra.gmra.mxu0 %vm1311_vm9, %v1268_v23 }
 0x2d3   : > { %2514 = vmatpush.xpose.msk.msrb.mxu0 %vm1311_vm9, %v1290_v24 }
 0x2d4   : > { %v1357_v26 = vpop.f32.mrf.mxu3 }
 0x2d5   : > { %v1505_v27 = vmul.f32 0.35355338, %v1357_v26 }
 0x2d7   : > { %v1545_v28 = vadd.f32 %v2692_v25, %v1505_v27 }
 0x2d9   : > { %v1555_v30 = vsel %vm1311_vm9, %v1545_v28, -inf }
 0x2da   : > { %2515 = vmatmul.msk.f32.vlgmr.msrb.gmra.mxu0 %vm1311_vm9, %v1276_v29  ;;  %1556 = vmax.xlane.f32.xlu2 %v1555_v30 }
 0x334   : > { %v1453_v57 = vpop.f32.mrf.mxu2 }
 0x335   : > { %v1509_v61 = vmul.f32 0.35355338, %v1453_v57 }
 0x337   : > { %v1549_v2 = vadd.f32 %v2698_v0, %v1509_v61 }
 0x339   : > { %v1567_v3 = vsel %vm1311_vm9, %v1549_v2, -inf }
 0x340   : > { %v1554_v36 = vpop.xlane.xlu1 %1553 }
 0x341   : > { %v1576_v37 = vsub.f32 %v1544_v20, %v1554_v36 }
 0x343   : > { %v1584_v38 = vmul.f32 1.442695, %v1576_v37 }
 0x345   : > { %2707 = vpow2.f32 %v1584_v38  ;;  %v1381_v39 = vpop.f32.mrf.mxu3 }
 0x346   : > { %v1506_v50 = vmul.f32 0.35355338, %v1381_v39 }
 0x348   : > { %v1546_v60 = vadd.f32 %v2697_v53, %v1506_v50 }
 0x34a   : > { %v1429_v41 = vpop.f32.mrf.mxu1  ;;  %v1558_v1 = vsel %vm1311_vm9, %v1546_v60, -inf }
 0x34b   : > { %v2708_v42 = vpop.eup %2707  ;;  %v1508_v43 = vmul.f32 0.35355338, %v1429_v41 }
 0x34c   : > { %v1600_v44 = vsel %vm1311_vm9, %v2708_v42, 0.0 }
 0x34d   : > { %v1477_v46 = vpop.f32.mrf.mxu3  ;;  %1601 = vadd.xlane.f32.xlu2 %v1600_v44  ;;  %v1548_v47 = vadd.f32 %v2694_v40, %v1508_v43  ;;  %v1557_v5 = vpop.xlane.xlu2 %1556 }
 0x34e   : > { %v1510_v48 = vmul.f32 0.35355338, %v1477_v46  ;;  %v1577_v7 = vsub.f32 %v1545_v28, %v1557_v5 }
 0x34f   : > { %v1405_v51 = vpop.f32.mrf.mxu0  ;;  %v1564_v52 = vsel %vm1311_vm9, %v1548_v47, -inf }
 0x350   : > { %v1507_v54 = vmul.f32 0.35355338, %v1405_v51  ;;  %1565 = vmax.xlane.f32.xlu0 %v1564_v52  ;;  %v3641_v55 = vadd.f32 %v2695_v45, %v1510_v48  ;;  %v1586_v10 = vmul.f32 1.442695, %v1577_v7 }
 0x352   : > { %v1547_v59 = vadd.f32 %v2696_v49, %v1507_v54  ;;  %v1570_v62 = vsel %vm1311_vm9, %v3641_v55, -inf  ;;  %2709 = vpow2.f32 %v1586_v10 }
 0x354   : > { %v1561_v63 = vsel %vm1311_vm9, %v1547_v59, -inf }
 0x355   : > { %1571 = vmax.xlane.f32.xlu2 %v1570_v62  ;;  %1562 = vmax.xlane.f32.xlu1 %v1561_v63 }
 0x357   : > { %v1501_v6 = vpop.f32.mrf.mxu0 }
 0x358   : > { %1559 = vmax.xlane.f32.xlu0 %v1558_v1  ;;  %v1511_v8 = vmul.f32 0.35355338, %v1501_v6  ;;  %v3653_v13 = vpop.eup %2709 }
 0x359   : > { %v1603_v14 = vsel %vm1311_vm9, %v3653_v13, 0.0 }
 0x35a   : > { %v1551_v11 = vadd.f32 %v2699_v9, %v1511_v8 }
 0x35c   : > { %v1573_v12 = vsel %vm1311_vm9, %v1551_v11, -inf }
 0x35d   : > { %1568 = vmax.xlane.f32.xlu2 %v1567_v3 }
 0x36c   : > { %2685 = vrot.lane.b32.xlu0 %v2684_v4, %s3154_s6 }
 0x36e   : > { %1305 = vrot.lane.b32.xlu1 %v1258_v33, %s3152_s3 }
 0x375   : > { %1293 = vrot.lane.b32.xlu2 %v1258_v33, %s3153_s28 }
 0x396   : > { %1574 = vmax.xlane.f32.xlu0 %v1573_v12 }
 0x39e   : > { %1604 = vadd.xlane.f32.xlu0 %v1603_v14 }
 0x3c0   : > { %v1602_v15 = vpop.xlane.xlu2 %1601 }
 0x3c1   : > { %2711 = vrcp.f32 %v1602_v15 }
 0x3c3   : > { %v1566_v16 = vpop.xlane.xlu0 %1565 }
 0x3c4   : > { %v1580_v17 = vsub.f32 %v1548_v47, %v1566_v16 }
 0x3c6   : > { %v1592_v18 = vmul.f32 1.442695, %v1580_v17 }
 0x3c7   : > { %v2712_v19 = vpop.eup %2711 }
 0x3c8   : > { %v1632_v20 = vmul.f32 %v2712_v19, %v2708_v42  ;;  %2713 = vpow2.f32 %v1592_v18  ;;  %v1572_v21 = vpop.xlane.xlu2 %1571  ;;  %v1563_v22 = vpop.xlane.xlu1 %1562 }
 0x3c9   : > { %v1579_v26 = vsub.f32 %v1547_v59, %v1563_v22  ;;  %v1582_v34 = vsub.f32 %v3641_v55, %v1572_v21  ;;  %v1859_v22 = vld [vmem:[%s3483_s23 + $0x18] sm:$0xff] }
 0x3ca   : > { %2516 = vmatmul.msk.f32.vlgmr.msra.gmra.mxu1 %vm1311_vm9, %v1632_v20 }
 0x3cb   : > { %v1560_v23 = vpop.xlane.xlu0 %1559  ;;  %v1590_v31 = vmul.f32 1.442695, %v1579_v26  ;;  %v1596_v38 = vmul.f32 1.442695, %v1582_v34 }
 0x3cc   : > { %v1578_v24 = vsub.f32 %v1546_v60, %v1560_v23  ;;  %v1858_v23 = vld [vmem:[%s3483_s23 + $0x10] sm:$0xff] }
 0x3ce   : > { %v2714_v25 = vpop.eup %2713  ;;  %v1588_v27 = vmul.f32 1.442695, %v1578_v24  ;;  %v1857_v24 = vld [vmem:[%s3483_s23 + $0x8] sm:$0xff] }
 0x3cf   : > { %v1612_v28 = vsel %vm1311_vm9, %v2714_v25, 0.0 }
 0x3d0   : > { %2715 = vpow2.f32 %v1588_v27  ;;  %v1569_v29 = vpop.xlane.xlu2 %1568  ;;  %1613 = vadd.xlane.f32.xlu0 %v1612_v28 }
 0x3d1   : > { %v1581_v30 = vsub.f32 %v1549_v2, %v1569_v29 }
 0x3d3   : > { %v1594_v32 = vmul.f32 1.442695, %v1581_v30 }
 0x3d5   : > { %2717 = vpow2.f32 %v1594_v32 }
 0x3d6   : > { %v2716_v33 = vpop.eup %2715  ;;  %2719 = vpow2.f32 %v1590_v31 }
 0x3d7   : > { %v1606_v36 = vsel %vm1311_vm9, %v2716_v33, 0.0  ;;  %2721 = vpow2.f32 %v1596_v38 }
 0x3d8   : > { %v1294_v37 = vpop.permute.xlu2 %1293  ;;  %1607 = vadd.xlane.f32.xlu1 %v1606_v36 }
 0x3d9   : > { %1704 = vmatpush.msrb.mxu3 %v1294_v37 }
 0x3db   : > { %v2718_v39 = vpop.eup %2717 }
 0x3dc   : > { %v2720_v40 = vpop.eup %2719  ;;  %v1615_v41 = vsel %vm1311_vm9, %v2718_v39, 0.0 }
 0x3dd   : > { %1616 = vadd.xlane.f32.xlu0 %v1615_v41  ;;  %v1609_v43 = vsel %vm1311_vm9, %v2720_v40, 0.0  ;;  %v2722_v47 = vpop.eup %2721 }
 0x3de   : > { %v2686_v42 = vpop.permute.xlu0 %2685  ;;  %v1618_v48 = vsel %vm1311_vm9, %v2722_v47, 0.0 }
 0x3df   : > { %v2688_v44 = vunpack.i.h.bf16 %v2686_v42  ;;  %v2687_v45 = vunpack.i.l.bf16 %v2686_v42 }
 0x3e0   : > { %1610 = vadd.xlane.f32.xlu1 %v1609_v43  ;;  %v1306_v46 = vpop.permute.xlu1 %1305 }
 0x3e1   : > { %1796 = vmatpush.msra.mxu3 %v1306_v46  ;;  %1750 = vmatpush.msrb.mxu1 %v2687_v45 }
 0x3e2   : > { %1773 = vmatpush.msrb.mxu2 %v2688_v44 }
 0x3e3   : > { %1882 = vmatpush.msra.mxu1 %v1859_v22 }
 0x3e5   : > { %1883 = vmatpush.msra.mxu1 %v1858_v23 }
 0x3e7   : > { %1884 = vmatpush.msra.mxu1 %v1857_v24 }
 0x3e8   : > { %1619 = vadd.xlane.f32.xlu1 %v1618_v48  ;;  %v3158_v48 = vmov 32.0  }
 0x3f1   : > { %1307 = vrot.lane.b32.xlu0 %v3636_v35, %s3152_s3  ;;  %s3897_s3 = scalar_lea.vmem [#allocation14], %s3480_s7 }
 0x401   : > { %1295 = vrot.lane.b32.xlu1 %v3636_v35, %s3153_s28 }
 0x409   : > { %v1575_v49 = vpop.xlane.xlu0 %1574 }
 0x40a   : > { %v1583_v50 = vsub.f32 %v1551_v11, %v1575_v49 }
 0x40c   : > { %v1598_v51 = vmul.f32 1.442695, %v1583_v50 }
 0x40e   : > { %2723 = vpow2.f32 %v1598_v51 }
 0x411   : > { %v1605_v52 = vpop.xlane.xlu0 %1604 }
 0x412   : > { %2725 = vrcp.f32 %v1605_v52 }
 0x414   : > { %v2724_v53 = vpop.eup %2723 }
 0x415   : > { %v1621_v54 = vsel %vm1311_vm9, %v2724_v53, 0.0 }
 0x416   : > { %1622 = vadd.xlane.f32.xlu2 %v1621_v54 }
 0x418   : > { %v2726_v55 = vpop.eup %2725 }
 0x419   : > { %v1633_v57 = vmul.f32 %v2726_v55, %v3653_v13 }
 0x41b   : > { %2517 = vmatmul.msk.f32.vlgmr.msra.gmra.mxu2 %vm1311_vm9, %v1633_v57 }
 0x443   : > { %v1614_v59 = vpop.xlane.xlu0 %1613 }
 0x444   : > { %2727 = vrcp.f32 %v1614_v59 }
 0x447   : > { %v1660_v14 = vpop.f32.mrf.mxu1 }
 0x44a   : > { %v2728_v60 = vpop.eup %2727 }
 0x44b   : > { %v1636_v61 = vmul.f32 %v2728_v60, %v2714_v25  ;;  %v1608_v35 = vpop.xlane.xlu1 %1607  ;;  %v1856_v25 = vld [vmem:[%s3483_s23] sm:$0xff] }
 0x44c   : > { %2729 = vrcp.f32 %v1608_v35  ;;  %1885 = vmatpush.msra.mxu1 %v1856_v25 }
 0x44d   : > { %2520 = vmatmul.msk.f32.vlgmr.msrb.gmra.mxu1 %vm1311_vm9, %v1636_v61 }
 0x450   : > { %v1617_v62 = vpop.xlane.xlu0 %1616 }
 0x451   : > { %2731 = vrcp.f32 %v1617_v62 }
 0x452   : > { %v2730_v63 = vpop.eup %2729 }
 0x453   : > { %v1634_v0 = vmul.f32 %v2730_v63, %v2716_v33  ;;  %v1611_v1 = vpop.xlane.xlu1 %1610 }
 0x455   : > { %2518 = vmatmul.msk.f32.vlgmr.msrb.gmra.mxu3 %vm1311_vm9, %v1634_v0  ;;  %v1961_v0 = vld [vmem:[%s3490_s17 + $0x18] sm:$0xff] }
 0x456   : > { %1984 = vmatpush.msra.mxu2 %v1961_v0  ;;  %v2704_v0 = vld [vmem:[%s1085_s29] ss:$0 sm:$0xff] }
 0x457   : > { %v2732_v2 = vpop.eup %2731 }
 0x458   : > { %v1637_v3 = vmul.f32 %v2732_v2, %v2718_v39  ;;  %v2700_v39 = vld [vmem:[%s3891_s8] ss:$0 sm:$0xff]  ;;  %v1959_v2 = vld [vmem:[%s3490_s17 + $0x8] sm:$0xff] }
 0x45a   : > { %2521 = vmatmul.msk.f32.vlgmr.msrb.gmra.mxu2 %vm1311_vm9, %v1637_v3  ;;  %v1958_v3 = vld [vmem:[%s3490_s17] sm:$0xff] }
 0x45b   : > { %v1620_v4 = vpop.xlane.xlu1 %1619 }
 0x45c   : > { %2733 = vrcp.f32 %v1620_v4 }
 0x45d   : > { %2735 = vrcp.f32 %v1611_v1  ;;  %v1960_v1 = vld [vmem:[%s3490_s17 + $0x10] sm:$0xff]  ;;  %s3893_s17 = scalar_lea.vmem [#allocation12], %s3480_s7 }
 0x45e   : > { %1985 = vmatpush.msra.mxu2 %v1960_v1 }
 0x460   : > { %1986 = vmatpush.msra.mxu2 %v1959_v2 }
 0x462   : > { %v2734_v5 = vpop.eup %2733  ;;  %1987 = vmatpush.msra.mxu2 %v1958_v3 }
 0x463   : > { %v1638_v6 = vmul.f32 %v2734_v5, %v2722_v47  ;;  %v2736_v7 = vpop.eup %2735  ;;  %v1308_v10 = vpop.permute.xlu0 %1307 }
 0x464   : > { %v1635_v8 = vmul.f32 %v2736_v7, %v2720_v40 }
 0x465   : > { %2522 = vmatmul.msk.f32.vlgmr.msra.gmra.mxu3 %vm1311_vm9, %v1638_v6 }
 0x473   : > { %v1296_v9 = vpop.permute.xlu1 %1295 }
 0x474   : > { %1727 = vmatpush.msra.mxu0 %v1296_v9 }
 0x475   : > { %2519 = vmatmul.msk.f32.vlgmr.msra.gmra.mxu0 %vm1311_vm9, %v1635_v8 }
 0x476   : > { %1819 = vmatpush.msrb.mxu0 %v1308_v10 }
 0x489   : > { %v1623_v11 = vpop.xlane.xlu2 %1622 }
 0x48a   : > { %2737 = vrcp.f32 %v1623_v11 }
 0x48b   : > { %2739 = vrcp.f32 %v3158_v48 }
 0x490   : > { %v2738_v12 = vpop.eup %2737 }
 0x491   : > { %v1639_v13 = vmul.f32 %v2738_v12, %v2724_v53  ;;  %v2740_v49 = vpop.eup %2739 }
 0x492   : > { %v1904_v50 = vmul.f32 32.0, %v2740_v49  ;;  %vm1908_vm12 = vweird.f32 %v2740_v49 }
 0x493   : > { %2523 = vmatmul.msk.f32.vlgmr.msrb.gmra.mxu0 %vm1311_vm9, %v1639_v13  ;;  %v2701_v13 = vld [vmem:[%s1074_s14] ss:$0 sm:$0xff] }
 0x494   : > { %v1905_v51 = vsub.f32 1.0, %v1904_v50 }
 0x496   : > { %v1906_v52 = vmul.f32 %v2740_v49, %v1905_v51 }
 0x498   : > { %v1907_v53 = vadd.f32 %v2740_v49, %v1906_v52 }
 0x49e   : > { %v1683_v17 = vpop.f32.mrf.mxu2 }
 0x4ca   : > { %v1752_v15 = vpop.f32.mrf.mxu1 }
 0x4cb   : > { %1834 = vrot.lane.b32.xlu0 %v1752_v15, %s3155_s15 }
 0x4d8   : > { %v1706_v16 = vpop.f32.mrf.mxu3 }
 0x4d9   : > { %1826 = vrot.lane.b32.xlu1 %v1706_v16, %s3156_s0  ;;  %v2702_v16 = vld [vmem:[%s3893_s17] ss:$0 sm:$0xff] }
 0x4dd   : > { %v1775_v19 = vpop.f32.mrf.mxu2 }
 0x4e8   : > { %v1798_v18 = vpop.f32.mrf.mxu3 }
 0x4e9   : > { %1842 = vrot.lane.b32.xlu1 %v1798_v18, %s3157_s24 }
 0x4f1   : > { %1836 = vrot.lane.b32.xlu1 %v1775_v19, %s3155_s15 }
 0x4f2   : > { %v1729_v20 = vpop.f32.mrf.mxu0 }
 0x4f3   : > { %1828 = vrot.lane.b32.xlu0 %v1729_v20, %s3156_s0 }
 0x510   : > { %v1821_v21 = vpop.f32.mrf.mxu0 }
 0x511   : > { %1844 = vrot.lane.b32.xlu0 %v1821_v21, %s3157_s24 }
 0x53d   : > { %v1835_v28 = vpop.permute.xlu0 %1834 }
 0x54b   : > { %v1827_v26 = vpop.permute.xlu1 %1826 }
 0x54c   : > { %v1848_v27 = vsel %vm1311_vm9, %v1660_v14, %v1827_v26 }
 0x54d   : > { %v1851_v30 = vsel %vm1850_vm10, %v1848_v27, %v1835_v28 }
 0x55b   : > { %v1843_v29 = vpop.permute.xlu1 %1842 }
 0x55c   : > { %v1854_v31 = vsel %vm1853_vm11, %v1851_v30, %v1843_v29 }
 0x55d   : > { %2524 = vmatmul.msk.f32.vlgmr.msra.gmra.mxu1 %vm1171_vm8, %v1854_v31 }
 0x563   : > { %v1837_v34 = vpop.permute.xlu1 %1836 }
 0x565   : > { %v1829_v32 = vpop.permute.xlu0 %1828 }
 0x566   : > { %v1849_v33 = vsel %vm1311_vm9, %v1683_v17, %v1829_v32  ;;  %v2020_v32 = vld [vmem:[%s3549_s26 + $0x38] sm:$0xff] }
 0x567   : > { %v1852_v37 = vsel %vm1850_vm10, %v1849_v33, %v1837_v34  ;;  %2040 = vmatpush.msrb.mxu3 %v2020_v32  ;;  %v2019_v33 = vld [vmem:[%s3549_s26 + $0x30] sm:$0xff]  ;;  %v2018_v34 = vld [vmem:[%s3549_s26 + $0x28] sm:$0xff] }
 0x569   : > { %2041 = vmatpush.msrb.mxu3 %v2019_v33 }
 0x56b   : > { %2042 = vmatpush.msrb.mxu3 %v2018_v34 }
 0x583   : > { %v1845_v36 = vpop.permute.xlu0 %1844 }
 0x584   : > { %v1855_v38 = vsel %vm1853_vm11, %v1852_v37, %v1845_v36  ;;  %v2017_v36 = vld [vmem:[%s3549_s26 + $0x20] sm:$0xff]  ;;  %v2016_v37 = vld [vmem:[%s3549_s26 + $0x18] sm:$0xff] }
 0x585   : > { %2525 = vmatmul.msk.f32.gmra.mxu1 %vm1171_vm8, %v1855_v38  ;;  %2043 = vmatpush.msrb.mxu3 %v2017_v36  ;;  %v2015_v38 = vld [vmem:[%s3549_s26 + $0x10] sm:$0xff] }
 0x587   : > { %2044 = vmatpush.msrb.mxu3 %v2016_v37 }
 0x589   : > { %2045 = vmatpush.msrb.mxu3 %v2015_v38 }
 0x5da   : > { %v1887_v40 = vpop.f32.mrf.mxu1 }
 0x5db   : > { %v1888_v41 = vadd.f32 %v2700_v39, %v1887_v40  ;;  %v2013_v40 = vld [vmem:[%s3549_s26] sm:$0xff] }
 0x5dd   : > { %v1893_v42 = vadd.f32 %v1888_v41, %v3570_v56  ;;  %v3696_v56 = vsel %vm1908_vm12, %v2740_v49, %v1907_v53  ;;  %v2703_v41 = vld [vmem:[%s1077_s2] ss:$0 sm:$0xff] }
 0x5df   : > { %v1897_v43 = vsel %vm1171_vm8, %v1893_v42, 0.0 }
 0x5e0   : > { %1898 = vadd.xlane.f32.xlu2 %v1897_v43 }
 0x602   : > { %v1890_v44 = vpop.f32.mrf.mxu1 }
 0x603   : > { %v1891_v45 = vadd.f32 %v2700_v39, %v1890_v44  ;;  %v2014_v39 = vld [vmem:[%s3549_s26 + $0x8] sm:$0xff] }
 0x604   : > { %2046 = vmatpush.msrb.mxu3 %v2014_v39 }
 0x605   : > { %v1894_v46 = vadd.f32 %v1891_v45, %v3577_v58 }
 0x606   : > { %2047 = vmatpush.msrb.mxu3 %v2013_v40 }
 0x607   : > { %v1900_v47 = vsel %vm1171_vm8, %v1894_v46, 0.0 }
 0x608   : > { %1901 = vadd.xlane.f32.xlu1 %v1900_v47 }
 0x653   : > { %v1899_v54 = vpop.xlane.xlu2 %1898 }
 0x654   : > { %v1910_v55 = vmul.f32 %v3696_v56, %v1899_v54 }
 0x656   : > { %v1912_v58 = vsub.f32 %v1893_v42, %v1910_v55 }
 0x658   : > { %v1914_v57 = vmul.f32 %v1912_v58, %v1912_v58 }
 0x65a   : > { %v1916_v59 = vsel %vm1171_vm8, %v1914_v57, 0.0 }
 0x65b   : > { %1917 = vadd.xlane.f32.xlu0 %v1916_v59 }
 0x67b   : > { %v1902_v60 = vpop.xlane.xlu1 %1901 }
 0x67c   : > { %v1911_v61 = vmul.f32 %v3696_v56, %v1902_v60 }
 0x67e   : > { %v1913_v35 = vsub.f32 %v1894_v46, %v1911_v61 }
 0x680   : > { %v1915_v62 = vmul.f32 %v1913_v35, %v1913_v35 }
 0x682   : > { %v1919_v63 = vsel %vm1171_vm8, %v1915_v62, 0.0 }
 0x683   : > { %1920 = vadd.xlane.f32.xlu2 %v1919_v63 }
 0x6ce   : > { %v1918_v4 = vpop.xlane.xlu0 %1917 }
 0x6cf   : > { %v1922_v5 = vmul.f32 %v1918_v4, %v3696_v56 }
 0x6d1   : > { %v1924_v6 = vadd.f32 1e-12, %v1922_v5 }
 0x6d3   : > { %2741 = vrsqrt.f32 %v1924_v6  ;;  %vm1932_vm14 = vweird.f32 %v1924_v6 }
 0x6d9   : > { %v2742_v7 = vpop.eup %2741 }
 0x6da   : > { %v1927_v8 = vmul.f32 %v2742_v7, %v1924_v6  ;;  %vm1933_vm13 = vweird.f32 %v2742_v7 }
 0x6db   : > { %vm1934_vm15 = vmor %vm1932_vm14, %vm1933_vm13 }
 0x6dc   : > { %v1928_v9 = vmul.f32 %v2742_v7, %v1927_v8 }
 0x6de   : > { %v1929_v10 = vmul.f32 0.5, %v1928_v9 }
 0x6e0   : > { %v1930_v11 = vsub.f32 1.5, %v1929_v10 }
 0x6e2   : > { %v1931_v12 = vmul.f32 %v2742_v7, %v1930_v11 }
 0x6e4   : > { %v1935_v14 = vsel %vm1934_vm15, %v2742_v7, %v1931_v12 }
 0x6e5   : > { %v1946_v15 = vmul.f32 %v1935_v14, %v1912_v58 }
 0x6e7   : > { %v1951_v17 = vmul.f32 %v2701_v13, %v1946_v15 }
 0x6e9   : > { %v3714_v18 = vadd.f32 %v2702_v16, %v1951_v17 }
 0x6eb   : > { %2526 = vmatmul.msk.f32.vlgmr.msra.gmra.mxu2 %vm1171_vm8, %v3714_v18 }
 0x6f6   : > { %v1921_v19 = vpop.xlane.xlu2 %1920 }
 0x6f7   : > { %v1923_v20 = vmul.f32 %v1921_v19, %v3696_v56 }
 0x6f9   : > { %v1925_v21 = vadd.f32 1e-12, %v1923_v20 }
 0x6fb   : > { %2743 = vrsqrt.f32 %v1925_v21  ;;  %vm1942_vm1 = vweird.f32 %v1925_v21 }
 0x701   : > { %v2744_v22 = vpop.eup %2743 }
 0x702   : > { %v1937_v23 = vmul.f32 %v2744_v22, %v1925_v21  ;;  %vm1943_vm0 = vweird.f32 %v2744_v22 }
 0x703   : > { %vm1944_vm2 = vmor %vm1942_vm1, %vm1943_vm0 }
 0x704   : > { %v1938_v24 = vmul.f32 %v2744_v22, %v1937_v23 }
 0x706   : > { %v1939_v25 = vmul.f32 0.5, %v1938_v24 }
 0x708   : > { %v1940_v26 = vsub.f32 1.5, %v1939_v25 }
 0x70a   : > { %v1941_v27 = vmul.f32 %v2744_v22, %v1940_v26 }
 0x70c   : > { %v1945_v28 = vsel %vm1944_vm2, %v2744_v22, %v1941_v27 }
 0x70d   : > { %v1947_v29 = vmul.f32 %v1945_v28, %v1913_v35  ;;  %v2705_v28 = vld [vmem:[%s1088_s13] ss:$0 sm:$0xff] }
 0x70f   : > { %v1952_v30 = vmul.f32 %v2701_v13, %v1947_v29 }
 0x711   : > { %v1957_v31 = vadd.f32 %v2702_v16, %v1952_v30  ;;  %v2706_v30 = vld [vmem:[%s3897_s3] ss:$0 sm:$0xff] }
 0x713   : > { %2527 = vmatmul.msk.f32.gmra.mxu2 %vm1171_vm8, %v1957_v31 }
 0x76e   : > { %v1989_v42 = vpop.f32.mrf.mxu2 }
 0x76f   : > { %v1990_v43 = vadd.f32 %v2703_v41, %v1989_v42 }
 0x771   : > { %v1997_v44 = vmul.f32 0.044715, %v1990_v43  ;;  %v1995_v50 = vmul.f32 0.5, %v1990_v43 }
 0x773   : > { %v1999_v45 = vmul.f32 %v1997_v44, %v1990_v43 }
 0x775   : > { %v2001_v46 = vmul.f32 %v1999_v45, %v1990_v43 }
 0x777   : > { %v2003_v47 = vadd.f32 %v2001_v46, %v1990_v43 }
 0x779   : > { %v2005_v48 = vmul.f32 0.7978846, %v2003_v47 }
 0x77b   : > { %2745 = vtanh.f32 %v2005_v48 }
 0x781   : > { %v2746_v49 = vpop.eup %2745 }
 0x782   : > { %v2009_v51 = vadd.f32 1.0, %v2746_v49 }
 0x784   : > { %v2011_v52 = vmul.f32 %v2009_v51, %v1995_v50 }
 0x786   : > { %2528 = vmatmul.msk.f32.vlgmr.msrb.gmra.mxu3 %vm2025_vm3, %v2011_v52 }
 0x796   : > { %v1992_v53 = vpop.f32.mrf.mxu2 }
 0x797   : > { %v1993_v54 = vadd.f32 %v2703_v41, %v1992_v53 }
 0x799   : > { %v1998_v55 = vmul.f32 0.044715, %v1993_v54  ;;  %v1996_v35 = vmul.f32 0.5, %v1993_v54 }
 0x79b   : > { %v2000_v58 = vmul.f32 %v1998_v55, %v1993_v54 }
 0x79d   : > { %v2002_v57 = vmul.f32 %v2000_v58, %v1993_v54 }
 0x79f   : > { %v2004_v59 = vadd.f32 %v2002_v57, %v1993_v54 }
 0x7a1   : > { %v2006_v60 = vmul.f32 0.7978846, %v2004_v59 }
 0x7a3   : > { %2747 = vtanh.f32 %v2006_v60 }
 0x7a9   : > { %v2748_v61 = vpop.eup %2747 }
 0x7aa   : > { %v2010_v62 = vadd.f32 1.0, %v2748_v61 }
 0x7ac   : > { %v2012_v63 = vmul.f32 %v2010_v62, %v1996_v35 }
 0x7ae   : > { %2529 = vmatmul.msk.f32.gmra.mxu3 %vm2025_vm3, %v2012_v63 }
 0x809   : > { %v2049_v1 = vpop.f32.mrf.mxu3 }
 0x80a   : > { %v2050_v2 = vadd.f32 %v2704_v0, %v2049_v1 }
 0x80c   : > { %v2055_v3 = vadd.f32 %v2050_v2, %v3714_v18 }
 0x80e   : > { %v2059_v4 = vsel %vm1171_vm8, %v2055_v3, 0.0 }
 0x80f   : > { %2060 = vadd.xlane.f32.xlu2 %v2059_v4 }
 0x831   : > { %v2052_v5 = vpop.f32.mrf.mxu3 }
 0x832   : > { %v2053_v6 = vadd.f32 %v2704_v0, %v2052_v5 }
 0x834   : > { %v2056_v7 = vadd.f32 %v2053_v6, %v1957_v31 }
 0x836   : > { %v2062_v8 = vsel %vm1171_vm8, %v2056_v7, 0.0 }
 0x837   : > { %2063 = vadd.xlane.f32.xlu2 %v2062_v8 }
 0x882   : > { %v2061_v9 = vpop.xlane.xlu2 %2060 }
 0x883   : > { %v2065_v10 = vmul.f32 %v2061_v9, %v3696_v56 }
 0x885   : > { %v2067_v11 = vsub.f32 %v2055_v3, %v2065_v10 }
 0x887   : > { %v2069_v12 = vmul.f32 %v2067_v11, %v2067_v11 }
 0x889   : > { %v2071_v13 = vsel %vm1171_vm8, %v2069_v12, 0.0 }
 0x88a   : > { %2072 = vadd.xlane.f32.xlu2 %v2071_v13 }
 0x8aa   : > { %v2064_v14 = vpop.xlane.xlu2 %2063 }
 0x8ab   : > { %v2066_v15 = vmul.f32 %v2064_v14, %v3696_v56 }
 0x8ad   : > { %v2068_v16 = vsub.f32 %v2056_v7, %v2066_v15 }
 0x8af   : > { %v2070_v17 = vmul.f32 %v2068_v16, %v2068_v16 }
 0x8b1   : > { %v2074_v18 = vsel %vm1171_vm8, %v2070_v17, 0.0 }
 0x8b2   : > { %2075 = vadd.xlane.f32.xlu2 %v2074_v18 }
 0x8fd   : > { %v2073_v19 = vpop.xlane.xlu2 %2072 }
 0x8fe   : > { %v2077_v20 = vmul.f32 %v2073_v19, %v3696_v56 }
 0x900   : > { %v2079_v21 = vadd.f32 1e-12, %v2077_v20 }
 0x902   : > { %2749 = vrsqrt.f32 %v2079_v21  ;;  %vm2087_vm5 = vweird.f32 %v2079_v21 }
 0x908   : > { %v2750_v22 = vpop.eup %2749 }
 0x909   : > { %v2082_v23 = vmul.f32 %v2750_v22, %v2079_v21  ;;  %vm2088_vm4 = vweird.f32 %v2750_v22 }
 0x90a   : > { %vm2089_vm6 = vmor %vm2087_vm5, %vm2088_vm4 }
 0x90b   : > { %v2083_v24 = vmul.f32 %v2750_v22, %v2082_v23 }
 0x90d   : > { %v2084_v25 = vmul.f32 0.5, %v2083_v24 }
 0x90f   : > { %v2085_v26 = vsub.f32 1.5, %v2084_v25 }
 0x911   : > { %v2086_v27 = vmul.f32 %v2750_v22, %v2085_v26 }
 0x913   : > { %v2090_v29 = vsel %vm2089_vm6, %v2750_v22, %v2086_v27 }
 0x914   : > { %v2101_v31 = vmul.f32 %v2090_v29, %v2067_v11 }
 0x916   : > { %v2106_v32 = vmul.f32 %v2705_v28, %v2101_v31 }
 0x918   : > { %v2111_v33 = vadd.f32 %v2706_v30, %v2106_v32 }
 0x91a   : > { %2113 = vst.msk [vmem:[#allocation2] sm:$0xff] %vm1171_vm8, %v2111_v33 }
 0x925   : > { %v2076_v34 = vpop.xlane.xlu2 %2075 }
 0x926   : > { %v2078_v36 = vmul.f32 %v2076_v34, %v3696_v56 }
 0x928   : > { %v2080_v37 = vadd.f32 1e-12, %v2078_v36 }
 0x92a   : > { %2751 = vrsqrt.f32 %v2080_v37  ;;  %vm2097_vm9 = vweird.f32 %v2080_v37 }
 0x930   : > { %v2752_v38 = vpop.eup %2751 }
 0x931   : > { %v2092_v39 = vmul.f32 %v2752_v38, %v2080_v37  ;;  %vm2098_vm7 = vweird.f32 %v2752_v38 }
 0x932   : > { %vm2099_vm10 = vmor %vm2097_vm9, %vm2098_vm7 }
 0x933   : > { %v2093_v40 = vmul.f32 %v2752_v38, %v2092_v39 }
 0x935   : > { %v2094_v41 = vmul.f32 0.5, %v2093_v40 }
 0x937   : > { %v2095_v42 = vsub.f32 1.5, %v2094_v41 }
 0x939   : > { %v2096_v43 = vmul.f32 %v2752_v38, %v2095_v42 }
 0x93b   : > { %v2100_v44 = vsel %vm2099_vm10, %v2752_v38, %v2096_v43 }
 0x93c   : > { %v2102_v45 = vmul.f32 %v2100_v44, %v2068_v16 }
 0x93e   : > { %v2107_v46 = vmul.f32 %v2705_v28, %v2102_v45  ;;  %2118 = sbr.rel (%p2530_p1) target bundleno = 2515 (0x9d3), region = 152 }
 0x940   : > { %v2112_v47 = vadd.f32 %v2706_v30, %v2107_v46 }
 0x942   : > { %2114 = vst.msk [vmem:[#allocation2 + $0x8] sm:$0xff] %vm1171_vm8, %v2112_v47 }
 0x943   : > { %2119 = vst.msk [vmem:[#allocation16] sm:$0xff] %vm1171_vm8, %v2111_v33  ;;  %v2124_v56 = vld [vmem:[#allocation15 + $0x18] sm:$0xff]  ;;  %v2123_v48 = vld [vmem:[#allocation15 + $0x10] sm:$0xff]  ;;  %v2131_v49 = vrot.slane %v2112_v47, 7  ;;  %v2122_v50 = vld [vmem:[#allocation15 + $0x8] sm:$0xff]  ;;  %vm2132_vm11 = vcmask 1041409  }
 0x944   : > { %2120 = vst.msk [vmem:[#allocation16 + $0x8] sm:$0xff] %vm1171_vm8, %v2112_v47  ;;  %2148 = vmatpush.msra.mxu0 %v2124_v56  ;;  %v2121_v51 = vld [vmem:[#allocation15] sm:$0xff]  ;;  %v2753_v53 = vld [vmem:[%s3898_s10] ss:$0 sm:$0xff]  ;;  %vm2157_vm12 = vcmask 254976  }
 0x945   : > { %v2133_v52 = vsel %vm2132_vm11, %v2131_v49, %v2111_v33 }
 0x946   : > { %2149 = vmatpush.msra.mxu0 %v2123_v48 }
 0x948   : > { %2150 = vmatpush.msra.mxu0 %v2122_v50 }
 0x94a   : > { %2151 = vmatpush.msra.mxu0 %v2121_v51 }
 0x94b   : > { %2531 = vmatmul.msk.f32.vlgmr.msra.gmra.mxu0 %vm1171_vm8, %v2133_v52 }
 0x9c8   : > { %v2153_v54 = vpop.f32.mrf.mxu0 }
 0x9c9   : > { %v2154_v55 = vadd.f32 %v2753_v53, %v2153_v54 }
 0x9cb   : > { %2754 = vtanh.f32 %v2154_v55 }
 0x9d1   : > { %v2755_v58 = vpop.eup %2754 }
 0x9d2   : > { %2158 = vst.msk [vmem:[#allocation17] sm:$0x3] %vm2157_vm12, %v2755_v58 }
 0x9d3 PF: > { %p2620_p4 = scmp.eq.s32.totalorder %s3301_s5, 1  ;;  %s3159_s28 = smov [#allocation16]  }
 0x9d4   : > { %s2164_s6 = sshll.u32 %s3159_s28, 4  ;;  %s3899_s1 = sld [smem:[#allocation51_spill]]  ;;  %s2165_s6 = int_to_ptr.vmem [resolvable:$true] %s2164_s6 }
 0x9d5   : > { %s3160_s24 = smov 128   ;;  %s3161_s23 = smov [#allocation17]  }
 0x9d6   : > { %s2179_s9 = sshll.u32 %s3161_s23, 4  ;;  %s3900_s19 = sld [smem:[#allocation52_spill]]  ;;  %s2180_s9 = int_to_ptr.vmem [resolvable:$true] %s2179_s9 }
 0x9da   : > { %s2166_s15 = sshll.u32 %s3899_s1, 4  ;;  %s2167_s15 = int_to_ptr.hbm [resolvable:$true] %s2166_s15 }
 0x9db   : > { %2573 = dma.vmem_to_hbm [thread:$0]  (%p2620_p4), %s2165_s6, 256, %s2167_s15, [#allocation5], %s3160_s24, %s3160_s24, %s3156_s0  }
 0x9dc   : > { %s2181_s20 = sshll.u32 %s3900_s19, 4  ;;  %s2182_s20 = int_to_ptr.hbm [resolvable:$true] %s2181_s20 }
 0x9dd   : > { %2575 = dma.vmem_to_hbm [thread:$0]  (%p2620_p4), %s2180_s9, 32, %s2182_s20, [#allocation18]  }
 0x9de   : > { %3119 = dma.done.wait (%p2620_p4), [#allocation5], 256  }
 0x9df   : > { %3121 = vsyncadd (%p2620_p4), [#allocation5], 4294967040 }
 0x9e0   : > { %3123 = dma.done.wait (%p2620_p4), [#allocation18], 32  }
 0x9e1   : > { %3125 = vsyncadd (%p2620_p4), [#allocation18], 4294967264 }
 0x9e2 PF: > { %s3901_s25 = sld [smem:[#allocation27_spill]]  ;;  %s3904_s4 = smov %s3132_s30 }
 0x9e3   : > { %s3902_s0 = sld [smem:[#allocation26_spill]] }
 0x9e4   : > { %s3903_s24 = sld [smem:[#allocation28_spill]] }
 0x9e8   : > { %p36_p5 = scmp.ge.s32.totalorder %s3901_s25, 4  }
 0x9e9   : > { %s3905_s30 = smov %s3902_s0 }
 0x9ea   :  { %38 = sbr.rel (!%p36_p5) target bundleno = 31 (0x1f), region = 249 }
 0x9ef   :  { %2200 = vsyncpa [#allocation4], 1 }
 0x9f0   :  { %2202 = vsyncpa [#allocation4 + $0x1], 1 }
 0x9f1   :  { %2203 = vsyncpa [#allocation7], 1 }
 0x9f2   :  { %2204 = vsyncpa [#allocation10], 1 }
 0x9f3   :  { %2205 = vsyncpa [#allocation5], 1 }
 0x9f4   :  { %2207 = vsyncpa [#allocation5 + $0x1], 1 }
 0x9f5   :  { %2208 = vsyncpa [#allocation18], 1 }

</bundles_post_ra>
